<compile_context>
chip_gen: v6e
topology: v6e:2x2x1
jax: 0.10.0
libtpu: 0.0.40
codegen_flags: <defaults>
</compile_context>

<pallas_src>
import jax
import jax.numpy as jnp
from jax.experimental import pallas as pl
from jax.experimental.pallas import tpu as pltpu

# ---------------- config (small, consistent with the module) ----------------
B, C, N_MAX = 2, 1, 16          # batch, canonical orders, max_num_nodes
HIDDEN = 32                     # config.model.hidden_dim
EMB = HIDDEN                    # embedding_dim == hidden_dim (GNN state dim)
ATT_EDGE_DIM = 8                # config.model.att_edge_dim  (edge_feat_dim = 16)
NODE_DIST_DIM = 8               # config.model.node_dist_feat_dim (dist feat = 16)
NUM_LAYERS = 2                  # num_GNN_layers
NUM_PROP = 1                    # num_GNN_prop
ATT_HIDDEN = 128                # GNN default att_hidden_dim
EDGE_WEIGHT = 1.0               # BCEWithLogits pos_weight

E = 64                          # number of GNN edges
M = 24                          # number of augmented-edge pairs (node_idx_gnn rows)
N_NODES = B * C * N_MAX         # 32 nodes in the merged graph

EDGE_IN_DIM = HIDDEN + 2 * ATT_EDGE_DIM + 2 * NODE_DIST_DIM   # 64
FEAT_DIM = 2 * ATT_EDGE_DIM + 2 * NODE_DIST_DIM               # 32
IDX_COLS = 9                    # packed index columns (see build_idx_pack)

# packed index column ids
IDX_E0, IDX_E1, IDX_ATT0, IDX_ATT1, IDX_DIST0, IDX_DIST1, IDX_NIF, IDX_G0, IDX_G1 = range(9)


# ----------------------------- fused kernel ----------------------------------
def trn_fused_kernel(
        A_ref, idx_ref, e1row_ref, label_ref,
        dec_w_ref, dec_b_ref,
        w1_ref, b1_ref, w2_ref, b2_ref,
        wl_ref, bl_ref,
        final_w_ref, final_b_ref,
        out_ref):
    f32, bf16 = jnp.float32, jnp.bfloat16
    N, Hd = N_NODES, HIDDEN

    def wdot(x, w):       # bf16 MXU contraction, f32 accumulation (weights already bf16)
        return jnp.dot(x.astype(bf16), w, preferred_element_type=f32)

    def mdot(mask, val):  # explicit bf16 single-pass MXU mask matmul (gather/scatter)
        return jnp.dot(mask.astype(bf16), val.astype(bf16), preferred_element_type=f32)

    def col(j, rows=None):
        if rows is None:
            return idx_ref[:, j:j + 1]
        return idx_ref[:rows, j:j + 1]

    # ---- decoder_input / decoder_input_c (packed into one matmul) ----
    nf_cat = wdot(A_ref[...], dec_w_ref[...]) + dec_b_ref[...]              # (N, 2H)

    # ---- node_feat[node_idx_feat] gather (index 0 -> zero row, bias excluded) ----
    nif = col(IDX_NIF, N)                                                   # (N, 1)
    colN = jax.lax.broadcasted_iota(jnp.int32, (N, N), 1)
    sel_feat = jnp.where(colN == nif - 1, 1.0, 0.0)                         # (N, N)
    state_cat = mdot(sel_feat, nf_cat)                                      # (N, 2H)
    state = state_cat[:, :Hd]
    state_c = state_cat[:, Hd:]

    # ---- edge-structure constants, built once in-kernel (no XLA one-hots) ----
    colE = jax.lax.broadcasted_iota(jnp.int32, (E, N), 1)
    sel_diff = (jnp.where(colE == col(IDX_E0), 1.0, 0.0)
                - jnp.where(colE == col(IDX_E1), 1.0, 0.0)).astype(bf16)    # (E, N)
    rowN = jax.lax.broadcasted_iota(jnp.int32, (N, E), 0)
    scat = jnp.where(rowN == e1row_ref[...], 1.0, 0.0).astype(bf16)         # (N, E)
    colF = jax.lax.broadcasted_iota(jnp.int32, (E, FEAT_DIM), 1)
    feat = jnp.where((colF == col(IDX_ATT0)) | (colF == col(IDX_ATT1))
                     | (colF == col(IDX_DIST0)) | (colF == col(IDX_DIST1)),
                     1.0, 0.0)                                              # (E, 32) f32

    # ---- GNN layers (statically unrolled, fully VMEM-resident) ----
    for li in range(NUM_LAYERS):
        if li > 0:
            state = jnp.maximum(state, 0.0)
        for _ in range(NUM_PROP):
            # fused edge contraction: [state_diff | feat] @ [att_w1 | msg_w1]
            state_diff = jnp.dot(sel_diff, state.astype(bf16),
                                 preferred_element_type=f32)                # (E, H)
            edge_in = jnp.concatenate([state_diff, feat], axis=1)           # (E, 64)
            h = jnp.maximum(wdot(edge_in, w1_ref[li]) + b1_ref[li], 0.0)    # (E, 160)
            # block-diagonal W2: one contraction -> [att_logits | msg_pre]
            z = wdot(h, w2_ref[li]) + b2_ref[li]                            # (E, 2H)
            att = jax.nn.sigmoid(z[:, :Hd])
            msg = z[:, Hd:] * att                                           # (E, H)
            # scatter_add over edge targets as a bf16 mask matmul
            state_msg = jnp.dot(scat, msg.astype(bf16),
                                preferred_element_type=f32)                 # (N, H)
            # fused LSTMCell: [state_msg | state] @ [[w_ih]; [w_hh]]  (i,f,g,o order)
            x_cat = jnp.concatenate([state_msg, state], axis=1)             # (N, 2H)
            gates = wdot(x_cat, wl_ref[li]) + bl_ref[li]                    # (N, 4H)
            s = jax.nn.sigmoid(gates)               # full (32,128) vreg EUP op
            i_g = s[:, 0:Hd]
            f_g = s[:, Hd:2 * Hd]
            o_g = s[:, 3 * Hd:4 * Hd]
            g_g = jnp.tanh(gates[:, 2 * Hd:3 * Hd])
            state_c = f_g * state_c + i_g * g_g
            state = o_g * jnp.tanh(state_c)

    # ---- final_layer + BCEWithLogitsLoss(pos_weight, reduction='none') ----
    colM = jax.lax.broadcasted_iota(jnp.int32, (M, N), 1)
    sel_g = (jnp.where(colM == col(IDX_G0, M), 1.0, 0.0)
             - jnp.where(colM == col(IDX_G1, M), 1.0, 0.0))                 # (M, N)
    diff = mdot(sel_g, state)                                               # (M, H)
    logits = (jnp.sum(diff * final_w_ref[...], axis=1, keepdims=True)
              + final_b_ref[...])                                           # (M, 1)
    y = label_ref[...]
    sp = jnp.maximum(-logits, 0.0) + jnp.log(1.0 + jnp.exp(-jnp.abs(logits)))
    out_ref[...] = (1.0 - y) * logits + (1.0 + (EDGE_WEIGHT - 1.0) * y) * sp


# ----------------------------- parameters ------------------------------------
def init_params(key):
    keys = iter(jax.random.split(key, 64))

    def w(shape, scale=0.1):
        return (scale * jax.random.normal(next(keys), shape)).astype(jnp.float32)

    params = {
        'dec_w': w((N_MAX, EMB)), 'dec_b': w((1, EMB)),
        'dec_c_w': w((N_MAX, EMB)), 'dec_c_b': w((1, EMB)),
        'final_w': w((HIDDEN, 1)), 'final_b': w((1, 1)),
        'layers': [],
    }
    for _ in range(NUM_LAYERS):
        params['layers'].append({
            'msg_w1': w((EDGE_IN_DIM, HIDDEN)), 'msg_b1': w((1, HIDDEN)),
            'msg_w2': w((HIDDEN, HIDDEN)), 'msg_b2': w((1, HIDDEN)),
            'att_w1': w((EDGE_IN_DIM, ATT_HIDDEN)), 'att_b1': w((1, ATT_HIDDEN)),
            'att_w2': w((ATT_HIDDEN, HIDDEN)), 'att_b2': w((1, HIDDEN)),
            'w_ih': w((HIDDEN, 4 * HIDDEN)),   # pre-transposed LSTMCell weights
            'w_hh': w((HIDDEN, 4 * HIDDEN)),
            'b_lstm': w((1, 4 * HIDDEN)),      # b_ih + b_hh folded together
        })
    return params


def pack_params(params):
    """Pack weights into the fused-kernel layout (bf16 weights, f32 biases)."""
    bf16, f32 = jnp.bfloat16, jnp.float32
    H, AH = HIDDEN, ATT_HIDDEN
    w1, b1, w2, b2, wl, bl = [], [], [], [], [], []
    for lp in params['layers']:
        # fused edge-MLP layer 1: [state_diff | feat] @ [att_w1 | msg_w1] -> (64, 160)
        w1.append(jnp.concatenate([lp['att_w1'], lp['msg_w1']], axis=1))
        b1.append(jnp.concatenate([lp['att_b1'], lp['msg_b1']], axis=1))
        # block-diagonal layer 2: rows 0:128 -> att cols 0:H, rows 128:160 -> msg cols H:2H
        top = jnp.concatenate([lp['att_w2'], jnp.zeros((AH, H), f32)], axis=1)
        bot = jnp.concatenate([jnp.zeros((H, H), f32), lp['msg_w2']], axis=1)
        w2.append(jnp.concatenate([top, bot], axis=0))                     # (160, 2H)
        b2.append(jnp.concatenate([lp['att_b2'], lp['msg_b2']], axis=1))   # (1, 2H)
        # fused LSTMCell: [state_msg | state] @ [[w_ih]; [w_hh]] -> (2H, 4H)
        wl.append(jnp.concatenate([lp['w_ih'], lp['w_hh']], axis=0))
        bl.append(lp['b_lstm'])

    def stk(xs, dt):
        return jnp.stack(xs).astype(dt)

    return dict(
        dec_w=jnp.concatenate([params['dec_w'], params['dec_c_w']], axis=1).astype(bf16),
        dec_b=jnp.concatenate([params['dec_b'], params['dec_c_b']], axis=1).astype(f32),
        w1=stk(w1, bf16), b1=stk(b1, f32),
        w2=stk(w2, bf16), b2=stk(b2, f32),
        wl=stk(wl, bf16), bl=stk(bl, f32),
        final_w=params['final_w'].T.astype(f32),     # (1, H)
        final_b=params['final_b'].astype(f32),       # (1, 1)
    )


# ------------------------- index packing (XLA glue) ---------------------------
def build_idx_pack(edges, node_idx_gnn, node_idx_feat, att_idx, node_dist):
    """Single (E, 9) int32 array carrying all tiny per-graph index vectors."""
    e0, e1 = edges[:, 0], edges[:, 1]

    def pad_e(x):
        return jnp.pad(x, (0, E - x.shape[0]))

    cols = [
        e0, e1,
        att_idx[e0],
        att_idx[e1] + ATT_EDGE_DIM,
        node_dist[e0] + 2 * ATT_EDGE_DIM,
        node_dist[e1] + 2 * ATT_EDGE_DIM + NODE_DIST_DIM,
        pad_e(node_idx_feat),
        pad_e(node_idx_gnn[:, 0]),
        pad_e(node_idx_gnn[:, 1]),
    ]
    return jnp.stack(cols, axis=1).astype(jnp.int32)     # (E, 9)


# ------------------------------- forward -------------------------------------
def trn_forward(params, A_pad, edges, node_idx_gnn, node_idx_feat, att_idx,
                node_dist, label):
    """Batched forward: leading axis G = independent graphs, one grid step each."""
    G = A_pad.shape[0]
    A_flat = A_pad.reshape(G, N_NODES, N_MAX).astype(jnp.float32)
    edges = edges.astype(jnp.int32)
    node_idx_gnn = node_idx_gnn.astype(jnp.int32)
    node_idx_feat = node_idx_feat.reshape(G, -1).astype(jnp.int32)
    att_idx = att_idx.reshape(G, -1).astype(jnp.int32)
    node_dist = node_dist.reshape(G, -1).astype(jnp.int32)
    label = label.reshape(G, M, 1).astype(jnp.float32)

    idx_pack = jax.vmap(build_idx_pack)(edges, node_idx_gnn, node_idx_feat,
                                        att_idx, node_dist)          # (G, E, 9)
    e1_row = edges[:, :, 1].reshape(G, 1, E)                          # (G, 1, E)

    pk = pack_params(params)

    def graph_spec(trailing):
        nd = len(trailing)
        return pl.BlockSpec((None,) + tuple(trailing),
                            lambda g, _nd=nd: (g,) + (0,) * _nd)

    def shared_spec(arr):
        nd = arr.ndim
        return pl.BlockSpec(arr.shape, lambda g, _nd=nd: (0,) * _nd)

    per_graph = [A_flat, idx_pack, e1_row, label]
    weights = [pk['dec_w'], pk['dec_b'],
               pk['w1'], pk['b1'], pk['w2'], pk['b2'],
               pk['wl'], pk['bl'],
               pk['final_w'], pk['final_b']]

    in_specs = ([graph_spec(x.shape[1:]) for x in per_graph]
                + [shared_spec(w) for w in weights])

    loss = pl.pallas_call(
        trn_fused_kernel,
        out_shape=jax.ShapeDtypeStruct((G, M, 1), jnp.float32),
        grid=(G,),
        in_specs=in_specs,
        out_specs=pl.BlockSpec((None, M, 1), lambda g: (g, 0, 0)),
        compiler_params=pltpu.CompilerParams(
            dimension_semantics=("parallel",)),
    )(*(per_graph + weights))
    return loss


# TODO(synk): the `is_sampling=True` branch (_sampling) uses networkx shortest
# paths + torch.multinomial autoregressive sampling and is not translated.

# --------------------------------- main --------------------------------------
if __name__ == "__main__":
    key = jax.random.PRNGKey(0)
    kp, k1, k2, k3, k4, k5, k6, k7 = jax.random.split(key, 8)
    params = init_params(kp)

    G = 4   # independent graphs per call -> parallel grid axis (fills v7x's 2 TCs)
    A_pad = (jax.random.uniform(k1, (G, B, C, N_MAX, N_MAX)) < 0.3).astype(jnp.float32)
    edges = jax.random.randint(k2, (G, E, 2), 0, N_NODES, dtype=jnp.int32)
    node_idx_gnn = jax.random.randint(k3, (G, M, 2), 0, N_NODES, dtype=jnp.int32)
    node_idx_feat = jax.random.randint(k4, (G, N_NODES), 0, N_NODES + 1, dtype=jnp.int32)
    att_idx = jax.random.randint(k5, (G, N_NODES), 0, ATT_EDGE_DIM, dtype=jnp.int32)
    node_dist = jax.random.randint(k6, (G, N_NODES, 1), 0, NODE_DIST_DIM, dtype=jnp.int32)
    label = (jax.random.uniform(k7, (G, M, 1)) < 0.5).astype(jnp.float32)

    fwd = jax.jit(trn_forward)
    loss = fwd(params, A_pad, edges, node_idx_gnn, node_idx_feat,
               att_idx, node_dist, label)
    loss = jax.block_until_ready(loss)
    assert loss.shape == (G, M, 1)
    assert bool(jnp.all(jnp.isfinite(loss)))
    print("KERNEL_OK")
</pallas_src>

<mosaic_0001>
module attributes {stable_mosaic.version = 11 : i64} {
  func.func @trn_fused_kernel(%arg0: i32, %arg1: memref<1x32x16xf32, #tpu.memory_space<vmem>>, %arg2: memref<1x64x9xi32, #tpu.memory_space<vmem>>, %arg3: memref<1x1x64xi32, #tpu.memory_space<vmem>>, %arg4: memref<1x24x1xf32, #tpu.memory_space<vmem>>, %arg5: memref<16x64xbf16, #tpu.memory_space<vmem>>, %arg6: memref<1x64xf32, #tpu.memory_space<vmem>>, %arg7: memref<2x64x160xbf16, #tpu.memory_space<vmem>>, %arg8: memref<2x1x160xf32, #tpu.memory_space<vmem>>, %arg9: memref<2x160x64xbf16, #tpu.memory_space<vmem>>, %arg10: memref<2x1x64xf32, #tpu.memory_space<vmem>>, %arg11: memref<2x64x128xbf16, #tpu.memory_space<vmem>>, %arg12: memref<2x1x128xf32, #tpu.memory_space<vmem>>, %arg13: memref<1x32xf32, #tpu.memory_space<vmem>>, %arg14: memref<1x1xf32, #tpu.memory_space<vmem>>, %arg15: memref<1x24x1xf32, #tpu.memory_space<vmem>>) attributes {dimension_semantics = [#tpu.dimension_semantics<parallel>], iteration_bounds = array<i64: 4>, scalar_prefetch = 0 : i64, scratch_operands = 0 : i64, tpu.core_type = #tpu.core_type<tc>, window_params = [{transform_indices = @transform_0, window_bounds = array<i64: 1, 32, 16>}, {transform_indices = @transform_1, window_bounds = array<i64: 1, 64, 9>}, {transform_indices = @transform_2, window_bounds = array<i64: 1, 1, 64>}, {transform_indices = @transform_3, window_bounds = array<i64: 1, 24, 1>}, {pipeline_mode = #tpu.pipeline_mode<synchronous>, transform_indices = @transform_4, window_bounds = array<i64: 16, 64>}, {pipeline_mode = #tpu.pipeline_mode<synchronous>, transform_indices = @transform_5, window_bounds = array<i64: 1, 64>}, {pipeline_mode = #tpu.pipeline_mode<synchronous>, transform_indices = @transform_6, window_bounds = array<i64: 2, 64, 160>}, {pipeline_mode = #tpu.pipeline_mode<synchronous>, transform_indices = @transform_7, window_bounds = array<i64: 2, 1, 160>}, {pipeline_mode = #tpu.pipeline_mode<synchronous>, transform_indices = @transform_8, window_bounds = array<i64: 2, 160, 64>}, {pipeline_mode = #tpu.pipeline_mode<synchronous>, transform_indices = @transform_9, window_bounds = array<i64: 2, 1, 64>}, {pipeline_mode = #tpu.pipeline_mode<synchronous>, transform_indices = @transform_10, window_bounds = array<i64: 2, 64, 128>}, {pipeline_mode = #tpu.pipeline_mode<synchronous>, transform_indices = @transform_11, window_bounds = array<i64: 2, 1, 128>}, {pipeline_mode = #tpu.pipeline_mode<synchronous>, transform_indices = @transform_12, window_bounds = array<i64: 1, 32>}, {pipeline_mode = #tpu.pipeline_mode<synchronous>, transform_indices = @transform_13, window_bounds = array<i64: 1, 1>}, {transform_indices = @transform_14, window_bounds = array<i64: 1, 24, 1>}]} {
    %c0 = arith.constant 0 : index
    %c0_0 = arith.constant 0 : index
    %c0_1 = arith.constant 0 : index
    %0 = vector.load %arg1[%c0, %c0_0, %c0_1] : memref<1x32x16xf32, #tpu.memory_space<vmem>>, vector<1x32x16xf32>
    %1 = vector.shape_cast %0 : vector<1x32x16xf32> to vector<32x16xf32>
    %c0_2 = arith.constant 0 : index
    %c0_3 = arith.constant 0 : index
    %2 = vector.load %arg5[%c0_2, %c0_3] : memref<16x64xbf16, #tpu.memory_space<vmem>>, vector<16x64xbf16>
    %3 = arith.truncf %1 : vector<32x16xf32> to vector<32x16xbf16>
    %cst = arith.constant dense<0.000000e+00> : vector<32x64xf32>
    %4 = tpu.matmul %3, %2, %cst {dimension_numbers = #tpu.dot_dimension_numbers<[1], [0], [0], [1], [0, 0, 1, 1], [], []>} : vector<32x16xbf16>, vector<16x64xbf16>, vector<32x64xf32> -> vector<32x64xf32>
    %c0_4 = arith.constant 0 : index
    %c0_5 = arith.constant 0 : index
    %5 = vector.load %arg6[%c0_4, %c0_5] : memref<1x64xf32, #tpu.memory_space<vmem>>, vector<1x64xf32>
    %6 = vector.broadcast %5 : vector<1x64xf32> to vector<32x64xf32>
    %7 = arith.addf %4, %6 : vector<32x64xf32>
    %c0_6 = arith.constant 0 : index
    %c0_7 = arith.constant 0 : index
    %c6 = arith.constant 6 : index
    %8 = vector.load %arg2[%c0_6, %c0_7, %c6] : memref<1x64x9xi32, #tpu.memory_space<vmem>>, vector<1x32x1xi32>
    %9 = vector.shape_cast %8 : vector<1x32x1xi32> to vector<32x1xi32>
    %10 = tpu.iota {dimensions = array<i32: 1>} : vector<32x32xi32>
    %c1_i32 = arith.constant 1 : i32
    %11 = vector.broadcast %c1_i32 : i32 to vector<32x1xi32>
    %12 = arith.subi %9, %11 : vector<32x1xi32>
    %13 = vector.broadcast %12 : vector<32x1xi32> to vector<32x32xi32>
    %14 = arith.cmpi eq, %10, %13 : vector<32x32xi32>
    %cst_8 = arith.constant 1.000000e+00 : f32
    %cst_9 = arith.constant 0.000000e+00 : f32
    %15 = vector.broadcast %cst_8 : f32 to vector<32x32xf32>
    %16 = vector.broadcast %cst_9 : f32 to vector<32x32xf32>
    %17 = arith.select %14, %15, %16 : vector<32x32xi1>, vector<32x32xf32>
    %18 = arith.truncf %17 : vector<32x32xf32> to vector<32x32xbf16>
    %19 = arith.truncf %7 : vector<32x64xf32> to vector<32x64xbf16>
    %cst_10 = arith.constant dense<0.000000e+00> : vector<32x64xf32>
    %20 = tpu.matmul %18, %19, %cst_10 {dimension_numbers = #tpu.dot_dimension_numbers<[1], [0], [0], [1], [0, 0, 1, 1], [], []>} : vector<32x32xbf16>, vector<32x64xbf16>, vector<32x64xf32> -> vector<32x64xf32>
    %21 = vector.extract_strided_slice %20 {offsets = [0, 0], sizes = [32, 32], strides = [1, 1]} : vector<32x64xf32> to vector<32x32xf32>
    %22 = vector.extract_strided_slice %20 {offsets = [0, 32], sizes = [32, 32], strides = [1, 1]} : vector<32x64xf32> to vector<32x32xf32>
    %23 = tpu.iota {dimensions = array<i32: 1>} : vector<64x32xi32>
    %c0_11 = arith.constant 0 : index
    %c0_12 = arith.constant 0 : index
    %c0_13 = arith.constant 0 : index
    %24 = vector.load %arg2[%c0_11, %c0_12, %c0_13] : memref<1x64x9xi32, #tpu.memory_space<vmem>>, vector<1x64x1xi32>
    %25 = vector.shape_cast %24 : vector<1x64x1xi32> to vector<64x1xi32>
    %26 = vector.broadcast %25 : vector<64x1xi32> to vector<64x32xi32>
    %27 = arith.cmpi eq, %23, %26 : vector<64x32xi32>
    %cst_14 = arith.constant 1.000000e+00 : f32
    %cst_15 = arith.constant 0.000000e+00 : f32
    %28 = vector.broadcast %cst_14 : f32 to vector<64x32xf32>
    %29 = vector.broadcast %cst_15 : f32 to vector<64x32xf32>
    %30 = arith.select %27, %28, %29 : vector<64x32xi1>, vector<64x32xf32>
    %c0_16 = arith.constant 0 : index
    %c0_17 = arith.constant 0 : index
    %c1 = arith.constant 1 : index
    %31 = vector.load %arg2[%c0_16, %c0_17, %c1] : memref<1x64x9xi32, #tpu.memory_space<vmem>>, vector<1x64x1xi32>
    %32 = vector.shape_cast %31 : vector<1x64x1xi32> to vector<64x1xi32>
    %33 = vector.broadcast %32 : vector<64x1xi32> to vector<64x32xi32>
    %34 = arith.cmpi eq, %23, %33 : vector<64x32xi32>
    %cst_18 = arith.constant 1.000000e+00 : f32
    %cst_19 = arith.constant 0.000000e+00 : f32
    %35 = vector.broadcast %cst_18 : f32 to vector<64x32xf32>
    %36 = vector.broadcast %cst_19 : f32 to vector<64x32xf32>
    %37 = arith.select %34, %35, %36 : vector<64x32xi1>, vector<64x32xf32>
    %38 = arith.subf %30, %37 : vector<64x32xf32>
    %39 = arith.truncf %38 : vector<64x32xf32> to vector<64x32xbf16>
    %40 = tpu.iota {dimensions = array<i32: 0>} : vector<32x64xi32>
    %c0_20 = arith.constant 0 : index
    %c0_21 = arith.constant 0 : index
    %c0_22 = arith.constant 0 : index
    %41 = vector.load %arg3[%c0_20, %c0_21, %c0_22] : memref<1x1x64xi32, #tpu.memory_space<vmem>>, vector<1x1x64xi32>
    %42 = vector.shape_cast %41 : vector<1x1x64xi32> to vector<1x64xi32>
    %43 = vector.broadcast %42 : vector<1x64xi32> to vector<32x64xi32>
    %44 = arith.cmpi eq, %40, %43 : vector<32x64xi32>
    %cst_23 = arith.constant 1.000000e+00 : f32
    %cst_24 = arith.constant 0.000000e+00 : f32
    %45 = vector.broadcast %cst_23 : f32 to vector<32x64xf32>
    %46 = vector.broadcast %cst_24 : f32 to vector<32x64xf32>
    %47 = arith.select %44, %45, %46 : vector<32x64xi1>, vector<32x64xf32>
    %48 = arith.truncf %47 : vector<32x64xf32> to vector<32x64xbf16>
    %49 = tpu.iota {dimensions = array<i32: 1>} : vector<64x32xi32>
    %c0_25 = arith.constant 0 : index
    %c0_26 = arith.constant 0 : index
    %c2 = arith.constant 2 : index
    %50 = vector.load %arg2[%c0_25, %c0_26, %c2] : memref<1x64x9xi32, #tpu.memory_space<vmem>>, vector<1x64x1xi32>
    %51 = vector.shape_cast %50 : vector<1x64x1xi32> to vector<64x1xi32>
    %52 = vector.broadcast %51 : vector<64x1xi32> to vector<64x32xi32>
    %53 = arith.cmpi eq, %49, %52 : vector<64x32xi32>
    %c0_27 = arith.constant 0 : index
    %c0_28 = arith.constant 0 : index
    %c3 = arith.constant 3 : index
    %54 = vector.load %arg2[%c0_27, %c0_28, %c3] : memref<1x64x9xi32, #tpu.memory_space<vmem>>, vector<1x64x1xi32>
    %55 = vector.shape_cast %54 : vector<1x64x1xi32> to vector<64x1xi32>
    %56 = vector.broadcast %55 : vector<64x1xi32> to vector<64x32xi32>
    %57 = arith.cmpi eq, %49, %56 : vector<64x32xi32>
    %58 = arith.ori %53, %57 : vector<64x32xi1>
    %c0_29 = arith.constant 0 : index
    %c0_30 = arith.constant 0 : index
    %c4 = arith.constant 4 : index
    %59 = vector.load %arg2[%c0_29, %c0_30, %c4] : memref<1x64x9xi32, #tpu.memory_space<vmem>>, vector<1x64x1xi32>
    %60 = vector.shape_cast %59 : vector<1x64x1xi32> to vector<64x1xi32>
    %61 = vector.broadcast %60 : vector<64x1xi32> to vector<64x32xi32>
    %62 = arith.cmpi eq, %49, %61 : vector<64x32xi32>
    %63 = arith.ori %58, %62 : vector<64x32xi1>
    %c0_31 = arith.constant 0 : index
    %c0_32 = arith.constant 0 : index
    %c5 = arith.constant 5 : index
    %64 = vector.load %arg2[%c0_31, %c0_32, %c5] : memref<1x64x9xi32, #tpu.memory_space<vmem>>, vector<1x64x1xi32>
    %65 = vector.shape_cast %64 : vector<1x64x1xi32> to vector<64x1xi32>
    %66 = vector.broadcast %65 : vector<64x1xi32> to vector<64x32xi32>
    %67 = arith.cmpi eq, %49, %66 : vector<64x32xi32>
    %68 = arith.ori %63, %67 : vector<64x32xi1>
    %cst_33 = arith.constant 1.000000e+00 : f32
    %cst_34 = arith.constant 0.000000e+00 : f32
    %69 = vector.broadcast %cst_33 : f32 to vector<64x32xf32>
    %70 = vector.broadcast %cst_34 : f32 to vector<64x32xf32>
    %71 = arith.select %68, %69, %70 : vector<64x32xi1>, vector<64x32xf32>
    %72 = arith.truncf %21 : vector<32x32xf32> to vector<32x32xbf16>
    %cst_35 = arith.constant dense<0.000000e+00> : vector<64x32xf32>
    %73 = tpu.matmul %39, %72, %cst_35 {dimension_numbers = #tpu.dot_dimension_numbers<[1], [0], [0], [1], [0, 0, 1, 1], [], []>} : vector<64x32xbf16>, vector<32x32xbf16>, vector<64x32xf32> -> vector<64x32xf32>
    %74 = tpu.concatenate %73, %71 in 1 : vector<64x32xf32>, vector<64x32xf32> -> vector<64x64xf32>
    %c0_36 = arith.constant 0 : index
    %c0_37 = arith.constant 0 : index
    %c0_38 = arith.constant 0 : index
    %75 = vector.load %arg7[%c0_36, %c0_37, %c0_38] : memref<2x64x160xbf16, #tpu.memory_space<vmem>>, vector<1x64x160xbf16>
    %76 = vector.shape_cast %75 : vector<1x64x160xbf16> to vector<64x160xbf16>
    %77 = arith.truncf %74 : vector<64x64xf32> to vector<64x64xbf16>
    %cst_39 = arith.constant dense<0.000000e+00> : vector<64x160xf32>
    %78 = tpu.matmul %77, %76, %cst_39 {dimension_numbers = #tpu.dot_dimension_numbers<[1], [0], [0], [1], [0, 0, 1, 1], [], []>} : vector<64x64xbf16>, vector<64x160xbf16>, vector<64x160xf32> -> vector<64x160xf32>
    %c0_40 = arith.constant 0 : index
    %c0_41 = arith.constant 0 : index
    %c0_42 = arith.constant 0 : index
    %79 = vector.load %arg8[%c0_40, %c0_41, %c0_42] : memref<2x1x160xf32, #tpu.memory_space<vmem>>, vector<1x1x160xf32>
    %80 = vector.shape_cast %79 : vector<1x1x160xf32> to vector<1x160xf32>
    %81 = vector.broadcast %80 : vector<1x160xf32> to vector<64x160xf32>
    %82 = arith.addf %78, %81 : vector<64x160xf32>
    %cst_43 = arith.constant 0.000000e+00 : f32
    %83 = vector.broadcast %cst_43 : f32 to vector<64x160xf32>
    %84 = arith.maximumf %82, %83 : vector<64x160xf32>
    %c0_44 = arith.constant 0 : index
    %c0_45 = arith.constant 0 : index
    %c0_46 = arith.constant 0 : index
    %85 = vector.load %arg9[%c0_44, %c0_45, %c0_46] : memref<2x160x64xbf16, #tpu.memory_space<vmem>>, vector<1x160x64xbf16>
    %86 = vector.shape_cast %85 : vector<1x160x64xbf16> to vector<160x64xbf16>
    %87 = arith.truncf %84 : vector<64x160xf32> to vector<64x160xbf16>
    %cst_47 = arith.constant dense<0.000000e+00> : vector<64x64xf32>
    %88 = tpu.matmul %87, %86, %cst_47 {dimension_numbers = #tpu.dot_dimension_numbers<[1], [0], [0], [1], [0, 0, 1, 1], [], []>} : vector<64x160xbf16>, vector<160x64xbf16>, vector<64x64xf32> -> vector<64x64xf32>
    %c0_48 = arith.constant 0 : index
    %c0_49 = arith.constant 0 : index
    %c0_50 = arith.constant 0 : index
    %89 = vector.load %arg10[%c0_48, %c0_49, %c0_50] : memref<2x1x64xf32, #tpu.memory_space<vmem>>, vector<1x1x64xf32>
    %90 = vector.shape_cast %89 : vector<1x1x64xf32> to vector<1x64xf32>
    %91 = vector.broadcast %90 : vector<1x64xf32> to vector<64x64xf32>
    %92 = arith.addf %88, %91 : vector<64x64xf32>
    %93 = vector.extract_strided_slice %92 {offsets = [0, 0], sizes = [64, 32], strides = [1, 1]} : vector<64x64xf32> to vector<64x32xf32>
    %94 = arith.negf %93 : vector<64x32xf32>
    %95 = math.exp %94 : vector<64x32xf32>
    %cst_51 = arith.constant 1.000000e+00 : f32
    %96 = vector.broadcast %cst_51 : f32 to vector<64x32xf32>
    %97 = arith.addf %96, %95 : vector<64x32xf32>
    %98 = arith.divf %96, %97 : vector<64x32xf32>
    %99 = vector.extract_strided_slice %92 {offsets = [0, 32], sizes = [64, 32], strides = [1, 1]} : vector<64x64xf32> to vector<64x32xf32>
    %100 = arith.mulf %99, %98 : vector<64x32xf32>
    %101 = arith.truncf %100 : vector<64x32xf32> to vector<64x32xbf16>
    %cst_52 = arith.constant dense<0.000000e+00> : vector<32x32xf32>
    %102 = tpu.matmul %48, %101, %cst_52 {dimension_numbers = #tpu.dot_dimension_numbers<[1], [0], [0], [1], [0, 0, 1, 1], [], []>} : vector<32x64xbf16>, vector<64x32xbf16>, vector<32x32xf32> -> vector<32x32xf32>
    %103 = tpu.concatenate %102, %21 in 1 : vector<32x32xf32>, vector<32x32xf32> -> vector<32x64xf32>
    %c0_53 = arith.constant 0 : index
    %c0_54 = arith.constant 0 : index
    %c0_55 = arith.constant 0 : index
    %104 = vector.load %arg11[%c0_53, %c0_54, %c0_55] : memref<2x64x128xbf16, #tpu.memory_space<vmem>>, vector<1x64x128xbf16>
    %105 = vector.shape_cast %104 : vector<1x64x128xbf16> to vector<64x128xbf16>
    %106 = arith.truncf %103 : vector<32x64xf32> to vector<32x64xbf16>
    %cst_56 = arith.constant dense<0.000000e+00> : vector<32x128xf32>
    %107 = tpu.matmul %106, %105, %cst_56 {dimension_numbers = #tpu.dot_dimension_numbers<[1], [0], [0], [1], [0, 0, 1, 1], [], []>} : vector<32x64xbf16>, vector<64x128xbf16>, vector<32x128xf32> -> vector<32x128xf32>
    %c0_57 = arith.constant 0 : index
    %c0_58 = arith.constant 0 : index
    %c0_59 = arith.constant 0 : index
    %108 = vector.load %arg12[%c0_57, %c0_58, %c0_59] : memref<2x1x128xf32, #tpu.memory_space<vmem>>, vector<1x1x128xf32>
    %109 = vector.shape_cast %108 : vector<1x1x128xf32> to vector<1x128xf32>
    %110 = vector.broadcast %109 : vector<1x128xf32> to vector<32x128xf32>
    %111 = arith.addf %107, %110 : vector<32x128xf32>
    %112 = arith.negf %111 : vector<32x128xf32>
    %113 = math.exp %112 : vector<32x128xf32>
    %cst_60 = arith.constant 1.000000e+00 : f32
    %114 = vector.broadcast %cst_60 : f32 to vector<32x128xf32>
    %115 = arith.addf %114, %113 : vector<32x128xf32>
    %116 = arith.divf %114, %115 : vector<32x128xf32>
    %117 = vector.extract_strided_slice %116 {offsets = [0, 0], sizes = [32, 32], strides = [1, 1]} : vector<32x128xf32> to vector<32x32xf32>
    %118 = vector.extract_strided_slice %116 {offsets = [0, 32], sizes = [32, 32], strides = [1, 1]} : vector<32x128xf32> to vector<32x32xf32>
    %119 = vector.extract_strided_slice %116 {offsets = [0, 96], sizes = [32, 32], strides = [1, 1]} : vector<32x128xf32> to vector<32x32xf32>
    %120 = vector.extract_strided_slice %111 {offsets = [0, 64], sizes = [32, 32], strides = [1, 1]} : vector<32x128xf32> to vector<32x32xf32>
    %121 = math.tanh %120 : vector<32x32xf32>
    %122 = arith.mulf %118, %22 : vector<32x32xf32>
    %123 = arith.mulf %117, %121 : vector<32x32xf32>
    %124 = arith.addf %122, %123 : vector<32x32xf32>
    %125 = math.tanh %124 : vector<32x32xf32>
    %126 = arith.mulf %119, %125 : vector<32x32xf32>
    %cst_61 = arith.constant 0.000000e+00 : f32
    %127 = vector.broadcast %cst_61 : f32 to vector<32x32xf32>
    %128 = arith.maximumf %126, %127 : vector<32x32xf32>
    %129 = arith.truncf %128 : vector<32x32xf32> to vector<32x32xbf16>
    %cst_62 = arith.constant dense<0.000000e+00> : vector<64x32xf32>
    %130 = tpu.matmul %39, %129, %cst_62 {dimension_numbers = #tpu.dot_dimension_numbers<[1], [0], [0], [1], [0, 0, 1, 1], [], []>} : vector<64x32xbf16>, vector<32x32xbf16>, vector<64x32xf32> -> vector<64x32xf32>
    %131 = tpu.concatenate %130, %71 in 1 : vector<64x32xf32>, vector<64x32xf32> -> vector<64x64xf32>
    %c1_63 = arith.constant 1 : index
    %c0_64 = arith.constant 0 : index
    %c0_65 = arith.constant 0 : index
    %132 = vector.load %arg7[%c1_63, %c0_64, %c0_65] : memref<2x64x160xbf16, #tpu.memory_space<vmem>>, vector<1x64x160xbf16>
    %133 = vector.shape_cast %132 : vector<1x64x160xbf16> to vector<64x160xbf16>
    %134 = arith.truncf %131 : vector<64x64xf32> to vector<64x64xbf16>
    %cst_66 = arith.constant dense<0.000000e+00> : vector<64x160xf32>
    %135 = tpu.matmul %134, %133, %cst_66 {dimension_numbers = #tpu.dot_dimension_numbers<[1], [0], [0], [1], [0, 0, 1, 1], [], []>} : vector<64x64xbf16>, vector<64x160xbf16>, vector<64x160xf32> -> vector<64x160xf32>
    %c1_67 = arith.constant 1 : index
    %c0_68 = arith.constant 0 : index
    %c0_69 = arith.constant 0 : index
    %136 = vector.load %arg8[%c1_67, %c0_68, %c0_69] : memref<2x1x160xf32, #tpu.memory_space<vmem>>, vector<1x1x160xf32>
    %137 = vector.shape_cast %136 : vector<1x1x160xf32> to vector<1x160xf32>
    %138 = vector.broadcast %137 : vector<1x160xf32> to vector<64x160xf32>
    %139 = arith.addf %135, %138 : vector<64x160xf32>
    %cst_70 = arith.constant 0.000000e+00 : f32
    %140 = vector.broadcast %cst_70 : f32 to vector<64x160xf32>
    %141 = arith.maximumf %139, %140 : vector<64x160xf32>
    %c1_71 = arith.constant 1 : index
    %c0_72 = arith.constant 0 : index
    %c0_73 = arith.constant 0 : index
    %142 = vector.load %arg9[%c1_71, %c0_72, %c0_73] : memref<2x160x64xbf16, #tpu.memory_space<vmem>>, vector<1x160x64xbf16>
    %143 = vector.shape_cast %142 : vector<1x160x64xbf16> to vector<160x64xbf16>
    %144 = arith.truncf %141 : vector<64x160xf32> to vector<64x160xbf16>
    %cst_74 = arith.constant dense<0.000000e+00> : vector<64x64xf32>
    %145 = tpu.matmul %144, %143, %cst_74 {dimension_numbers = #tpu.dot_dimension_numbers<[1], [0], [0], [1], [0, 0, 1, 1], [], []>} : vector<64x160xbf16>, vector<160x64xbf16>, vector<64x64xf32> -> vector<64x64xf32>
    %c1_75 = arith.constant 1 : index
    %c0_76 = arith.constant 0 : index
    %c0_77 = arith.constant 0 : index
    %146 = vector.load %arg10[%c1_75, %c0_76, %c0_77] : memref<2x1x64xf32, #tpu.memory_space<vmem>>, vector<1x1x64xf32>
    %147 = vector.shape_cast %146 : vector<1x1x64xf32> to vector<1x64xf32>
    %148 = vector.broadcast %147 : vector<1x64xf32> to vector<64x64xf32>
    %149 = arith.addf %145, %148 : vector<64x64xf32>
    %150 = vector.extract_strided_slice %149 {offsets = [0, 0], sizes = [64, 32], strides = [1, 1]} : vector<64x64xf32> to vector<64x32xf32>
    %151 = arith.negf %150 : vector<64x32xf32>
    %152 = math.exp %151 : vector<64x32xf32>
    %cst_78 = arith.constant 1.000000e+00 : f32
    %153 = vector.broadcast %cst_78 : f32 to vector<64x32xf32>
    %154 = arith.addf %153, %152 : vector<64x32xf32>
    %155 = arith.divf %153, %154 : vector<64x32xf32>
    %156 = vector.extract_strided_slice %149 {offsets = [0, 32], sizes = [64, 32], strides = [1, 1]} : vector<64x64xf32> to vector<64x32xf32>
    %157 = arith.mulf %156, %155 : vector<64x32xf32>
    %158 = arith.truncf %157 : vector<64x32xf32> to vector<64x32xbf16>
    %cst_79 = arith.constant dense<0.000000e+00> : vector<32x32xf32>
    %159 = tpu.matmul %48, %158, %cst_79 {dimension_numbers = #tpu.dot_dimension_numbers<[1], [0], [0], [1], [0, 0, 1, 1], [], []>} : vector<32x64xbf16>, vector<64x32xbf16>, vector<32x32xf32> -> vector<32x32xf32>
    %160 = tpu.concatenate %159, %128 in 1 : vector<32x32xf32>, vector<32x32xf32> -> vector<32x64xf32>
    %c1_80 = arith.constant 1 : index
    %c0_81 = arith.constant 0 : index
    %c0_82 = arith.constant 0 : index
    %161 = vector.load %arg11[%c1_80, %c0_81, %c0_82] : memref<2x64x128xbf16, #tpu.memory_space<vmem>>, vector<1x64x128xbf16>
    %162 = vector.shape_cast %161 : vector<1x64x128xbf16> to vector<64x128xbf16>
    %163 = arith.truncf %160 : vector<32x64xf32> to vector<32x64xbf16>
    %cst_83 = arith.constant dense<0.000000e+00> : vector<32x128xf32>
    %164 = tpu.matmul %163, %162, %cst_83 {dimension_numbers = #tpu.dot_dimension_numbers<[1], [0], [0], [1], [0, 0, 1, 1], [], []>} : vector<32x64xbf16>, vector<64x128xbf16>, vector<32x128xf32> -> vector<32x128xf32>
    %c1_84 = arith.constant 1 : index
    %c0_85 = arith.constant 0 : index
    %c0_86 = arith.constant 0 : index
    %165 = vector.load %arg12[%c1_84, %c0_85, %c0_86] : memref<2x1x128xf32, #tpu.memory_space<vmem>>, vector<1x1x128xf32>
    %166 = vector.shape_cast %165 : vector<1x1x128xf32> to vector<1x128xf32>
    %167 = vector.broadcast %166 : vector<1x128xf32> to vector<32x128xf32>
    %168 = arith.addf %164, %167 : vector<32x128xf32>
    %169 = arith.negf %168 : vector<32x128xf32>
    %170 = math.exp %169 : vector<32x128xf32>
    %cst_87 = arith.constant 1.000000e+00 : f32
    %171 = vector.broadcast %cst_87 : f32 to vector<32x128xf32>
    %172 = arith.addf %171, %170 : vector<32x128xf32>
    %173 = arith.divf %171, %172 : vector<32x128xf32>
    %174 = vector.extract_strided_slice %173 {offsets = [0, 0], sizes = [32, 32], strides = [1, 1]} : vector<32x128xf32> to vector<32x32xf32>
    %175 = vector.extract_strided_slice %173 {offsets = [0, 32], sizes = [32, 32], strides = [1, 1]} : vector<32x128xf32> to vector<32x32xf32>
    %176 = vector.extract_strided_slice %173 {offsets = [0, 96], sizes = [32, 32], strides = [1, 1]} : vector<32x128xf32> to vector<32x32xf32>
    %177 = vector.extract_strided_slice %168 {offsets = [0, 64], sizes = [32, 32], strides = [1, 1]} : vector<32x128xf32> to vector<32x32xf32>
    %178 = math.tanh %177 : vector<32x32xf32>
    %179 = arith.mulf %175, %124 : vector<32x32xf32>
    %180 = arith.mulf %174, %178 : vector<32x32xf32>
    %181 = arith.addf %179, %180 : vector<32x32xf32>
    %182 = math.tanh %181 : vector<32x32xf32>
    %183 = arith.mulf %176, %182 : vector<32x32xf32>
    %184 = tpu.iota {dimensions = array<i32: 1>} : vector<24x32xi32>
    %c0_88 = arith.constant 0 : index
    %c0_89 = arith.constant 0 : index
    %c7 = arith.constant 7 : index
    %185 = vector.load %arg2[%c0_88, %c0_89, %c7] : memref<1x64x9xi32, #tpu.memory_space<vmem>>, vector<1x24x1xi32>
    %186 = vector.shape_cast %185 : vector<1x24x1xi32> to vector<24x1xi32>
    %187 = vector.broadcast %186 : vector<24x1xi32> to vector<24x32xi32>
    %188 = arith.cmpi eq, %184, %187 : vector<24x32xi32>
    %cst_90 = arith.constant 1.000000e+00 : f32
    %cst_91 = arith.constant 0.000000e+00 : f32
    %189 = vector.broadcast %cst_90 : f32 to vector<24x32xf32>
    %190 = vector.broadcast %cst_91 : f32 to vector<24x32xf32>
    %191 = arith.select %188, %189, %190 : vector<24x32xi1>, vector<24x32xf32>
    %c0_92 = arith.constant 0 : index
    %c0_93 = arith.constant 0 : index
    %c8 = arith.constant 8 : index
    %192 = vector.load %arg2[%c0_92, %c0_93, %c8] : memref<1x64x9xi32, #tpu.memory_space<vmem>>, vector<1x24x1xi32>
    %193 = vector.shape_cast %192 : vector<1x24x1xi32> to vector<24x1xi32>
    %194 = vector.broadcast %193 : vector<24x1xi32> to vector<24x32xi32>
    %195 = arith.cmpi eq, %184, %194 : vector<24x32xi32>
    %cst_94 = arith.constant 1.000000e+00 : f32
    %cst_95 = arith.constant 0.000000e+00 : f32
    %196 = vector.broadcast %cst_94 : f32 to vector<24x32xf32>
    %197 = vector.broadcast %cst_95 : f32 to vector<24x32xf32>
    %198 = arith.select %195, %196, %197 : vector<24x32xi1>, vector<24x32xf32>
    %199 = arith.subf %191, %198 : vector<24x32xf32>
    %200 = arith.truncf %199 : vector<24x32xf32> to vector<24x32xbf16>
    %201 = arith.truncf %183 : vector<32x32xf32> to vector<32x32xbf16>
    %cst_96 = arith.constant dense<0.000000e+00> : vector<24x32xf32>
    %202 = tpu.matmul %200, %201, %cst_96 {dimension_numbers = #tpu.dot_dimension_numbers<[1], [0], [0], [1], [0, 0, 1, 1], [], []>} : vector<24x32xbf16>, vector<32x32xbf16>, vector<24x32xf32> -> vector<24x32xf32>
    %c0_97 = arith.constant 0 : index
    %c0_98 = arith.constant 0 : index
    %203 = vector.load %arg13[%c0_97, %c0_98] : memref<1x32xf32, #tpu.memory_space<vmem>>, vector<1x32xf32>
    %204 = vector.broadcast %203 : vector<1x32xf32> to vector<24x32xf32>
    %205 = arith.mulf %202, %204 : vector<24x32xf32>
    %cst_99 = arith.constant dense<0.000000e+00> : vector<24xf32>
    %206 = vector.multi_reduction <add>, %205, %cst_99 [1] : vector<24x32xf32> to vector<24xf32>
    %207 = vector.shape_cast %206 : vector<24xf32> to vector<24x1xf32>
    %c0_100 = arith.constant 0 : index
    %c0_101 = arith.constant 0 : index
    %208 = vector.load %arg14[%c0_100, %c0_101] : memref<1x1xf32, #tpu.memory_space<vmem>>, vector<1x1xf32>
    %209 = vector.broadcast %208 : vector<1x1xf32> to vector<24x1xf32>
    %210 = arith.addf %207, %209 : vector<24x1xf32>
    %c0_102 = arith.constant 0 : index
    %c0_103 = arith.constant 0 : index
    %c0_104 = arith.constant 0 : index
    %211 = vector.load %arg4[%c0_102, %c0_103, %c0_104] : memref<1x24x1xf32, #tpu.memory_space<vmem>>, vector<1x24x1xf32>
    %212 = vector.shape_cast %211 : vector<1x24x1xf32> to vector<24x1xf32>
    %cst_105 = arith.constant 0.000000e+00 : f32
    %213 = vector.broadcast %cst_105 : f32 to vector<24x1xf32>
    %214 = arith.subf %213, %210 : vector<24x1xf32>
    %cst_106 = arith.constant 0.000000e+00 : f32
    %215 = vector.broadcast %cst_106 : f32 to vector<24x1xf32>
    %216 = arith.maximumf %214, %215 : vector<24x1xf32>
    %217 = math.absf %210 : vector<24x1xf32>
    %cst_107 = arith.constant 0.000000e+00 : f32
    %218 = vector.broadcast %cst_107 : f32 to vector<24x1xf32>
    %219 = arith.subf %218, %217 : vector<24x1xf32>
    %220 = math.exp %219 : vector<24x1xf32>
    %cst_108 = arith.constant 1.000000e+00 : f32
    %221 = vector.broadcast %cst_108 : f32 to vector<24x1xf32>
    %222 = arith.addf %221, %220 : vector<24x1xf32>
    %223 = math.log %222 : vector<24x1xf32>
    %224 = arith.addf %216, %223 : vector<24x1xf32>
    %cst_109 = arith.constant 1.000000e+00 : f32
    %225 = vector.broadcast %cst_109 : f32 to vector<24x1xf32>
    %226 = arith.subf %225, %212 : vector<24x1xf32>
    %227 = arith.mulf %226, %210 : vector<24x1xf32>
    %cst_110 = arith.constant 0.000000e+00 : f32
    %228 = vector.broadcast %cst_110 : f32 to vector<24x1xf32>
    %229 = arith.mulf %228, %212 : vector<24x1xf32>
    %cst_111 = arith.constant 1.000000e+00 : f32
    %230 = vector.broadcast %cst_111 : f32 to vector<24x1xf32>
    %231 = arith.addf %230, %229 : vector<24x1xf32>
    %232 = arith.mulf %231, %224 : vector<24x1xf32>
    %233 = arith.addf %227, %232 : vector<24x1xf32>
    %c0_112 = arith.constant 0 : index
    %c0_113 = arith.constant 0 : index
    %c0_114 = arith.constant 0 : index
    %234 = vector.load %arg15[%c0_112, %c0_113, %c0_114] : memref<1x24x1xf32, #tpu.memory_space<vmem>>, vector<1x24x1xf32>
    %235 = vector.shape_cast %234 : vector<1x24x1xf32> to vector<24x1xf32>
    %236 = vector.shape_cast %233 : vector<24x1xf32> to vector<1x24x1xf32>
    tpu.vector_store %arg15[%c0_112, %c0_113, %c0_114], %236 {strides = array<i32>} : memref<1x24x1xf32, #tpu.memory_space<vmem>>, vector<1x24x1xf32>,
    return
  }
  func.func @transform_0(%arg0: i32) -> (i32, i32, i32) {
    %c0_i32 = arith.constant 0 : i32
    %c0_i32_0 = arith.constant 0 : i32
    %c0_i32_1 = arith.constant 0 : i32
    return %arg0, %c0_i32, %c0_i32_0 : i32, i32, i32
  }
  func.func @transform_1(%arg0: i32) -> (i32, i32, i32) {
    %c0_i32 = arith.constant 0 : i32
    %c0_i32_0 = arith.constant 0 : i32
    %c0_i32_1 = arith.constant 0 : i32
    return %arg0, %c0_i32, %c0_i32_0 : i32, i32, i32
  }
  func.func @transform_2(%arg0: i32) -> (i32, i32, i32) {
    %c0_i32 = arith.constant 0 : i32
    %c0_i32_0 = arith.constant 0 : i32
    %c0_i32_1 = arith.constant 0 : i32
    return %arg0, %c0_i32, %c0_i32_0 : i32, i32, i32
  }
  func.func @transform_3(%arg0: i32) -> (i32, i32, i32) {
    %c0_i32 = arith.constant 0 : i32
    %c0_i32_0 = arith.constant 0 : i32
    %c0_i32_1 = arith.constant 0 : i32
    return %arg0, %c0_i32, %c0_i32_0 : i32, i32, i32
  }
  func.func @transform_4(%arg0: i32) -> (i32, i32) {
    %c0_i32 = arith.constant 0 : i32
    %c0_i32_0 = arith.constant 0 : i32
    %c0_i32_1 = arith.constant 0 : i32
    return %c0_i32, %c0_i32_0 : i32, i32
  }
  func.func @transform_5(%arg0: i32) -> (i32, i32) {
    %c0_i32 = arith.constant 0 : i32
    %c0_i32_0 = arith.constant 0 : i32
    %c0_i32_1 = arith.constant 0 : i32
    return %c0_i32, %c0_i32_0 : i32, i32
  }
  func.func @transform_6(%arg0: i32) -> (i32, i32, i32) {
    %c0_i32 = arith.constant 0 : i32
    %c0_i32_0 = arith.constant 0 : i32
    %c0_i32_1 = arith.constant 0 : i32
    %c0_i32_2 = arith.constant 0 : i32
    return %c0_i32, %c0_i32_0, %c0_i32_1 : i32, i32, i32
  }
  func.func @transform_7(%arg0: i32) -> (i32, i32, i32) {
    %c0_i32 = arith.constant 0 : i32
    %c0_i32_0 = arith.constant 0 : i32
    %c0_i32_1 = arith.constant 0 : i32
    %c0_i32_2 = arith.constant 0 : i32
    return %c0_i32, %c0_i32_0, %c0_i32_1 : i32, i32, i32
  }
  func.func @transform_8(%arg0: i32) -> (i32, i32, i32) {
    %c0_i32 = arith.constant 0 : i32
    %c0_i32_0 = arith.constant 0 : i32
    %c0_i32_1 = arith.constant 0 : i32
    %c0_i32_2 = arith.constant 0 : i32
    return %c0_i32, %c0_i32_0, %c0_i32_1 : i32, i32, i32
  }
  func.func @transform_9(%arg0: i32) -> (i32, i32, i32) {
    %c0_i32 = arith.constant 0 : i32
    %c0_i32_0 = arith.constant 0 : i32
    %c0_i32_1 = arith.constant 0 : i32
    %c0_i32_2 = arith.constant 0 : i32
    return %c0_i32, %c0_i32_0, %c0_i32_1 : i32, i32, i32
  }
  func.func @transform_10(%arg0: i32) -> (i32, i32, i32) {
    %c0_i32 = arith.constant 0 : i32
    %c0_i32_0 = arith.constant 0 : i32
    %c0_i32_1 = arith.constant 0 : i32
    %c0_i32_2 = arith.constant 0 : i32
    return %c0_i32, %c0_i32_0, %c0_i32_1 : i32, i32, i32
  }
  func.func @transform_11(%arg0: i32) -> (i32, i32, i32) {
    %c0_i32 = arith.constant 0 : i32
    %c0_i32_0 = arith.constant 0 : i32
    %c0_i32_1 = arith.constant 0 : i32
    %c0_i32_2 = arith.constant 0 : i32
    return %c0_i32, %c0_i32_0, %c0_i32_1 : i32, i32, i32
  }
  func.func @transform_12(%arg0: i32) -> (i32, i32) {
    %c0_i32 = arith.constant 0 : i32
    %c0_i32_0 = arith.constant 0 : i32
    %c0_i32_1 = arith.constant 0 : i32
    return %c0_i32, %c0_i32_0 : i32, i32
  }
  func.func @transform_13(%arg0: i32) -> (i32, i32) {
    %c0_i32 = arith.constant 0 : i32
    %c0_i32_0 = arith.constant 0 : i32
    %c0_i32_1 = arith.constant 0 : i32
    return %c0_i32, %c0_i32_0 : i32, i32
  }
  func.func @transform_14(%arg0: i32) -> (i32, i32, i32) {
    %c0_i32 = arith.constant 0 : i32
    %c0_i32_0 = arith.constant 0 : i32
    %c0_i32_1 = arith.constant 0 : i32
    return %arg0, %c0_i32, %c0_i32_0 : i32, i32, i32
  }
}

</mosaic_0001>

<bundles_post_ra>
// kernel: trn_forward.1
= control target key start
LH: loop header
LB: loop body
LE: loop exit
PB: predicated region body
PF: predicated region fallthrough
CT: control target
= control target key end

     0   :  { %s3585_s15 = smov 0   ;;  %s4351_s0 = inlined_call_operand.vmem [shape: f32[4,32,16], index: 0, kind: input, shape index: {}]   ;;  %s4352_s1 = inlined_call_operand.vmem [shape: s32[4,64,9], index: 1, kind: input, shape index: {}]   ;;  %s4353_s2 = inlined_call_operand.vmem [shape: s32[4,1,64], index: 2, kind: input, shape index: {}]   ;;  %s4354_s3 = inlined_call_operand.vmem [shape: f32[4,24,1], index: 3, kind: input, shape index: {}]   ;;  %s4355_s4 = inlined_call_operand.vmem [shape: bf16[16,64], index: 4, kind: input, shape index: {}]   ;;  %s4356_s5 = inlined_call_operand.vmem [shape: f32[1,64], index: 5, kind: input, shape index: {}]   ;;  %s4357_s6 = inlined_call_operand.vmem [shape: bf16[2,64,160], index: 6, kind: input, shape index: {}]   ;;  %s4358_s7 = inlined_call_operand.vmem [shape: f32[2,1,160], index: 7, kind: input, shape index: {}]   ;;  %s4359_s8 = inlined_call_operand.vmem [shape: bf16[2,160,64], index: 8, kind: input, shape index: {}]   ;;  %s4360_s9 = inlined_call_operand.vmem [shape: f32[2,1,64], index: 9, kind: input, shape index: {}]   ;;  %s4361_s10 = inlined_call_operand.vmem [shape: bf16[2,64,128], index: 10, kind: input, shape index: {}]   ;;  %s4362_s11 = inlined_call_operand.vmem [shape: f32[2,1,128], index: 11, kind: input, shape index: {}]   ;;  %s4363_s12 = inlined_call_operand.vmem [shape: f32[1,32], index: 12, kind: input, shape index: {}]   ;;  %s4364_s13 = inlined_call_operand.<no memory space> [shape: f32[1,1], index: 13, kind: input, shape index: {}]   ;;  %s4365_s14 = inlined_call_operand.vmem [shape: f32[4,24,1], index: 14, kind: output, shape index: {}]  }
   0x1   :  { %v19_v0 = vstv %s4364_s13 }
   0x2   :  { %20 = vst [vmem:[#allocation2] sm:$0x1] %v19_v0 }
   0x3 LB: > { %s2877_s16 = sadd.s32 4294967295, %s3492_s15   ;;  %p2881_p0 = scmp.ge.s32.totalorder %s3492_s15, 1  ;;  %s3492_s15 = sphi %s3585_s15, %s26_s15  }
   0x4   : > { %p442_p1 = scmp.lt.s32.totalorder %s3492_s15, 5 }
   0x6   : > { %p443_p2 = pnand %p2881_p0, %p442_p1 }
   0x7   : > { %p501_p3 = scmp.lt.s32.totalorder (!%p443_p2), %s2877_s16, 3  ;;  %s3502_s28 = smov (!%p443_p2), 32  }
   0x8   : > { %446 = sbr.rel (%p443_p2) target bundleno = 4466 (0x1172), region = 76  ;;  %s3504_s17 = smov (!%p443_p2), 64  }
   0xd   : > { %v3293_v1 = vld [vmem:[%s4355_s4] sm:$0xff]   ;;  %s4367_s16 = smov (!%p501_p3, %s2877_s16), 3  ;;  %v3494_v2 = vmov 6   ;;  %vm546_vm0 = vcmask 130048   ;;  %v3495_v17 = vmov 0   ;;  %v3496_v18 = vmov 1  }
   0xe   : > { %3097 = vmatprep.subr.bf16.mxu0 %v3293_v1  ;;  %3213 = vset.pattern.permute.xlu0 %v3494_v2  ;;  %s3048_s13 = sshll.u32 %s4367_s16, 5  ;;  %s3049_s19 = sshll.u32 %s4367_s16, 6  ;;  %v3497_v22 = vmov 3   ;;  %v3498_v23 = vmov 5   ;;  %v606_v24 = vlaneseq  ;;  %v3499_v28 = vmov 4  }
   0xf   : > { %3098 = vmatpush3.bf16.msra.mxu0 %v3293_v1  ;;  %3214 = vset.pattern.permute.xlu1 %v3494_v2  ;;  %s505_s22 = scalar_lea.vmem %s4351_s0, %s3048_s13  ;;  %s3606_s25 = scalar_lea.vmem %s4352_s1, %s3049_s19  ;;  %v3500_v30 = vmov 0.0   ;;  %vm636_vm3 = vcmask 261120   ;;  %v3501_v34 = vmov 2   ;;  %v2888_v37 = vld [vmem:[%s4356_s5] ss:$0 sm:$0xff] }
  0x10   : > { %v525_v3 = vld [vmem:[%s505_s22] sm:$0xff]  ;;  %v526_v4 = vld [vmem:[%s505_s22 + $0x8] sm:$0xff]  ;;  %v527_v5 = vld [vmem:[%s505_s22 + $0x10] sm:$0xff]  ;;  %v3661_v26 = vand.u32 127, %v606_v24  ;;  %s513_s18 = scalar_lea.vmem %s4353_s2, %s4367_s16  ;;  %s3503_s13 = smov 96  }
  0x11   : > { %v531_v6 = vpack.c.bf16 %v526_v4, %v525_v3  ;;  %v528_v7 = vld [vmem:[%s505_s22 + $0x18] sm:$0xff]  ;;  %v3609_v8 = vld [vmem:[%s3606_s25] sm:$0xff]  ;;  %v3612_v9 = vld [vmem:[%s3606_s25 + $0x10] sm:$0xff] }
  0x12   : > { %v532_v10 = vpack.c.bf16 %v528_v7, %v527_v5  ;;  %v2892_v11 = vadd.s32 4294967295, %v3609_v8  ;;  %v2894_v12 = vadd.s32 4294967295, %v3612_v9  ;;  %v3617_v13 = vld [vmem:[%s3606_s25 + $0x8] sm:$0xff]  ;;  %v3620_v14 = vld [vmem:[%s3606_s25 + $0x18] sm:$0xff]  ;;  %v3634_v19 = vld [vmem:[%s3606_s25 + $0x20] sm:$0xff] }
  0x13   : > { %3099 = vmatprep.mubr.msk.bf16.mxu0 %vm546_vm0, %v531_v6  ;;  %v2893_v15 = vadd.s32 4294967295, %v3617_v13  ;;  %v2895_v16 = vadd.s32 4294967295, %v3620_v14  ;;  %v3640_v20 = vld [vmem:[%s3606_s25 + $0x28] sm:$0xff]  ;;  %v3645_v21 = vld [vmem:[%s3606_s25 + $0x30] sm:$0xff]  ;;  %v3658_v25 = vld [vmem:[%s3606_s25 + $0x38] sm:$0xff] }
  0x14   : > { %3100 = vmatmul.mubr.msk.bf16.vlgmr.msra.gmra.mxu0 %vm546_vm0, %v532_v10  ;;  %613 = vperm.xlu0 %3213, %v2892_v11  }
  0x15   : > { %619 = vperm.xlu1 %3214, %v2894_v12  }
  0x18   : > { %616 = vperm.xlu0 %3213, %v2893_v15  }
  0x19   : > { %622 = vperm.xlu1 %3214, %v2895_v16  }
  0x1c   : > { %3215 = vset.pattern.permute.xlu0 %v3495_v17 }
  0x1d   : > { %3216 = vset.pattern.permute.xlu1 %v3495_v17  ;;  %701 = vperm.xlu0 %3215, %v3609_v8  }
  0x1e   : > { %704 = vperm.xlu1 %3216, %v3617_v13  }
  0x21   : > { %3218 = vset.pattern.permute.xlu0 %v3496_v18 }
  0x22   : > { %3217 = vset.pattern.permute.xlu1 %v3496_v18  ;;  %744 = vperm.xlu0 %3218, %v3617_v13  }
  0x23   : > { %741 = vperm.xlu1 %3217, %v3609_v8  }
  0x26   : > { %747 = vperm.xlu0 %3218, %v3612_v9  }
  0x27   : > { %3219 = vset.pattern.permute.xlu1 %v3495_v17 }
  0x28   : > { %707 = vperm.xlu1 %3219, %v3612_v9  }
  0x2a   : > { %3221 = vset.pattern.permute.xlu0 %v3495_v17 }
  0x2b   : > { %713 = vperm.xlu0 %3221, %v3634_v19  }
  0x2c   : > { %710 = vperm.xlu1 %3219, %v3620_v14  }
  0x2f   : > { %3224 = vset.pattern.permute.xlu0 %v3496_v18 }
  0x30   : > { %3220 = vset.pattern.permute.xlu1 %v3496_v18  ;;  %756 = vperm.xlu0 %3224, %v3640_v20  }
  0x31   : > { %750 = vperm.xlu1 %3220, %v3620_v14  }
  0x34   : > { %759 = vperm.xlu0 %3224, %v3645_v21  }
  0x35   : > { %3222 = vset.pattern.permute.xlu1 %v3495_v17 }
  0x36   : > { %716 = vperm.xlu1 %3222, %v3640_v20  }
  0x38   : > { %3229 = vset.pattern.permute.xlu0 %v3497_v22 }
  0x39   : > { %848 = vperm.xlu0 %3229, %v3617_v13  }
  0x3a   : > { %3223 = vset.pattern.permute.xlu1 %v3496_v18 }
  0x3b   : > { %753 = vperm.xlu1 %3223, %v3634_v19  }
  0x3d   : > { %3231 = vset.pattern.permute.xlu0 %v3498_v23 }
  0x3e   : > { %925 = vperm.xlu0 %3231, %v3609_v8  }
  0x3f   : > { %3225 = vset.pattern.permute.xlu1 %v3495_v17 }
  0x40   : > { %719 = vperm.xlu1 %3225, %v3645_v21  }
  0x42   : > { %934 = vperm.xlu0 %3231, %v3620_v14  }
  0x44   : > { %722 = vperm.xlu1 %3225, %v3658_v25  }
  0x46   : > { %3237 = vset.pattern.permute.xlu0 %v3499_v28 }
  0x47   : > { %891 = vperm.xlu0 %3237, %v3612_v9  }
  0x48   : > { %3226 = vset.pattern.permute.xlu1 %v3496_v18 }
  0x49   : > { %762 = vperm.xlu1 %3226, %v3658_v25  }
  0x4b   : > { %900 = vperm.xlu0 %3237, %v3640_v20  }
  0x4d   : > { %3227 = vset.pattern.permute.xlu1 %v3501_v34 }
  0x4e   : > { %816 = vperm.xlu1 %3227, %v3617_v13  }
  0x4f   : > { %3241 = vset.pattern.permute.xlu0 %v3501_v34 }
  0x50   : > { %813 = vperm.xlu0 %3241, %v3609_v8  }
  0x52   : > { %3228 = vset.pattern.permute.xlu1 %v3497_v22 }
  0x53   : > { %845 = vperm.xlu1 %3228, %v3609_v8  }
  0x54   : > { %822 = vperm.xlu0 %3241, %v3620_v14  }
  0x57   : > { %3230 = vset.pattern.permute.xlu1 %v3499_v28 }
  0x58   : > { %885 = vperm.xlu1 %3230, %v3609_v8   ;;  %831 = vperm.xlu0 %3241, %v3645_v21  }
  0x5c   : > { %888 = vperm.xlu1 %3230, %v3617_v13   ;;  %3243 = vset.pattern.permute.xlu0 %v3497_v22 }
  0x5d   : > { %857 = vperm.xlu0 %3243, %v3634_v19  }
  0x60   : > { %3232 = vset.pattern.permute.xlu1 %v3498_v23 }
  0x61   : > { %928 = vperm.xlu1 %3232, %v3617_v13   ;;  %866 = vperm.xlu0 %3243, %v3658_v25  }
  0x65   : > { %3233 = vset.pattern.permute.xlu1 %v3501_v34  ;;  %3247 = vset.pattern.permute.xlu0 %v3498_v23 }
  0x66   : > { %819 = vperm.xlu1 %3233, %v3612_v9   ;;  %943 = vperm.xlu0 %3247, %v3645_v21  }
  0x6a   : > { %3234 = vset.pattern.permute.xlu1 %v3497_v22 }
  0x6b   : > { %851 = vperm.xlu1 %3234, %v3612_v9  }
  0x6f   : > { %854 = vperm.xlu1 %3234, %v3620_v14  }
  0x73   : > { %3235 = vset.pattern.permute.xlu1 %v3499_v28 }
  0x74   : > { %894 = vperm.xlu1 %3235, %v3620_v14  }
  0x78   : > { %3236 = vset.pattern.permute.xlu1 %v3498_v23 }
  0x79   : > { %931 = vperm.xlu1 %3236, %v3612_v9  }
  0x7d   : > { %3238 = vset.pattern.permute.xlu1 %v3501_v34 }
  0x7e   : > { %825 = vperm.xlu1 %3238, %v3634_v19  }
  0x82   : > { %828 = vperm.xlu1 %3238, %v3640_v20  }
  0x86   : > { %3239 = vset.pattern.permute.xlu1 %v3497_v22 }
  0x87   : > { %860 = vperm.xlu1 %3239, %v3640_v20  }
  0x8b   : > { %3240 = vset.pattern.permute.xlu1 %v3499_v28 }
  0x8c   : > { %897 = vperm.xlu1 %3240, %v3634_v19  }
  0x8f   : > { %v614_v27 = vpop.permute.xlu0 %613 }
  0x90   : > { %vm624_vm1 = vcmp.eq.s32.totalorder %v3661_v26, %v614_v27  ;;  %v620_v36 = vpop.permute.xlu1 %619  ;;  %3242 = vset.pattern.permute.xlu1 %v3498_v23 }
  0x91   : > { %v628_v31 = vsel %vm624_vm1, 1.0, %v3500_v30  ;;  %937 = vperm.xlu1 %3242, %v3634_v19   ;;  %vm626_vm4 = vcmp.eq.s32.totalorder %v3661_v26, %v620_v36 }
  0x92   : > { %v630_v48 = vsel %vm626_vm4, 1.0, %v3500_v30 }
  0x93   : > { %v617_v29 = vpop.permute.xlu0 %616 }
  0x94   : > { %vm625_vm2 = vcmp.eq.s32.totalorder %v3661_v26, %v617_v29  ;;  %v623_v43 = vpop.permute.xlu1 %622 }
  0x95   : > { %v629_v32 = vsel %vm625_vm2, 1.0, %v3500_v30  ;;  %vm627_vm5 = vcmp.eq.s32.totalorder %v3661_v26, %v623_v43  ;;  %940 = vperm.xlu1 %3242, %v3640_v20  }
  0x96   : > { %v632_v33 = vpack.c.bf16 %v629_v32, %v628_v31  ;;  %v631_v49 = vsel %vm627_vm5, 1.0, %v3500_v30 }
  0x97   : > { %v633_v52 = vpack.c.bf16 %v631_v49, %v630_v48 }
  0x98   : > { %3107 = vmatprep.mubr.msk.bf16.mxu1 %vm636_vm3, %v632_v33  ;;  %v702_v51 = vpop.permute.xlu0 %701 }
  0x99   : > { %3244 = vset.pattern.permute.xlu1 %v3501_v34  ;;  %v705_v50 = vpop.permute.xlu1 %704  ;;  %vm724_vm7 = vcmp.eq.s32.totalorder %v3661_v26, %v702_v51  ;;  %v3296_v51 = vld [vmem:[%s4357_s6 + $0x34] ss:$8 sps:$4 sm:$0xff]  }
  0x9a   : > { %834 = vperm.xlu1 %3244, %v3658_v25   ;;  %vm725_vm6 = vcmp.eq.s32.totalorder %v3661_v26, %v705_v50  ;;  %v732_v54 = vsel %vm724_vm7, 1.0, %v3500_v30  ;;  %v3294_v50 = vld [vmem:[%s4357_s6 + $0x30] ss:$8 sps:$4 sm:$0xff]  }
  0x9b   : > { %v733_v53 = vsel %vm725_vm6, 1.0, %v3500_v30 }
  0x9d   : > { %v745_v56 = vpop.permute.xlu0 %744 }
  0x9e   : > { %3245 = vset.pattern.permute.xlu1 %v3497_v22  ;;  %v742_v55 = vpop.permute.xlu1 %741  ;;  %vm765_vm9 = vcmp.eq.s32.totalorder %v3661_v26, %v745_v56 }
  0x9f   : > { %863 = vperm.xlu1 %3245, %v3645_v21   ;;  %vm764_vm8 = vcmp.eq.s32.totalorder %v3661_v26, %v742_v55  ;;  %v773_v58 = vsel %vm765_vm9, 1.0, %v3500_v30 }
  0xa0   : > { %v772_v57 = vsel %vm764_vm8, 1.0, %v3500_v30  ;;  %v781_v60 = vsub.f32 %v733_v53, %v773_v58 }
  0xa1   : > { %v780_v59 = vsub.f32 %v732_v54, %v772_v57  ;;  %v3735_v63 = vpop.permute.xlu0 %747  ;;  %v3297_v54 = vld [vmem:[%s4357_s6 + $0x20] ss:$8 sps:$4 sm:$0xff]  }
  0xa3   : > { %3246 = vset.pattern.permute.xlu1 %v3499_v28  ;;  %v3728_v61 = vpack.c.bf16 %v781_v60, %v780_v59  ;;  %v3730_v62 = vpop.permute.xlu1 %707 }
  0xa4   : > { %903 = vperm.xlu1 %3246, %v3645_v21  }
  0xa5   : > { %3115 = vmatprep.mubr.msk.bf16.mxu0 %vm636_vm3, %v3728_v61 }
  0xa6   : > { %v714_v1 = vpop.permute.xlu0 %713 }
  0xa7   : > { %v3737_v0 = vpop.permute.xlu1 %710  ;;  %vm728_vm12 = vcmp.eq.s32.totalorder %v3661_v26, %v714_v1 }
  0xa8   : > { %906 = vperm.xlu1 %3246, %v3658_v25   ;;  %v736_v7 = vsel %vm728_vm12, 1.0, %v3500_v30 }
  0xab   : > { %v757_v3 = vpop.permute.xlu0 %756 }
  0xac   : > { %3248 = vset.pattern.permute.xlu1 %v3498_v23  ;;  %v3741_v2 = vpop.permute.xlu1 %750  ;;  %vm769_vm10 = vcmp.eq.s32.totalorder %v3661_v26, %v757_v3 }
  0xad   : > { %946 = vperm.xlu1 %3248, %v3658_v25   ;;  %v777_v6 = vsel %vm769_vm10, 1.0, %v3500_v30 }
  0xaf   : > { %v3756_v14 = vpop.permute.xlu0 %759 }
  0xb1   : > { %v717_v4 = vpop.permute.xlu1 %716 }
  0xb2   : > { %vm729_vm11 = vcmp.eq.s32.totalorder %v3661_v26, %v717_v4 }
  0xb3   : > { %v737_v5 = vsel %vm729_vm11, 1.0, %v3500_v30 }
  0xb4   : > { %v785_v9 = vsub.f32 %v737_v5, %v777_v6  ;;  %v849_v16 = vpop.permute.xlu0 %848 }
  0xb5   : > { %vm869_vm14 = vcmp.eq.s32.totalorder %v3661_v26, %v849_v16 }
  0xb6   : > { %v754_v8 = vpop.permute.xlu1 %753 }
  0xb7   : > { %vm768_vm13 = vcmp.eq.s32.totalorder %v3661_v26, %v754_v8 }
  0xb8   : > { %v776_v10 = vsel %vm768_vm13, 1.0, %v3500_v30 }
  0xb9   : > { %v784_v11 = vsub.f32 %v736_v7, %v776_v10  ;;  %v926_v19 = vpop.permute.xlu0 %925 }
  0xba   : > { %vm948_vm5 = vcmp.eq.s32.totalorder %v3661_v26, %v926_v19 }
  0xbb   : > { %v3752_v12 = vpack.c.bf16 %v785_v9, %v784_v11  ;;  %v3754_v13 = vpop.permute.xlu1 %719 }
  0xbd   : > { %v935_v21 = vpop.permute.xlu0 %934 }
  0xbf   : > { %v3758_v15 = vpop.permute.xlu1 %722 }
  0xc2   : > { %v892_v23 = vpop.permute.xlu0 %891 }
  0xc4   : > { %v3760_v18 = vpop.permute.xlu1 %762 }
  0xc6   : > { %v3764_v27 = vpop.permute.xlu0 %900 }
  0xc9   : > { %v817_v20 = vpop.permute.xlu1 %816 }
  0xca   : > { %vm837_vm15 = vcmp.eq.s32.totalorder %v3661_v26, %v817_v20 }
  0xcb   : > { %vm877_vm0 = vmor %vm837_vm15, %vm869_vm14  ;;  %v814_v29 = vpop.permute.xlu0 %813 }
  0xcc   : > { %vm836_vm7 = vcmp.eq.s32.totalorder %v3661_v26, %v814_v29 }
  0xce   : > { %v846_v22 = vpop.permute.xlu1 %845 }
  0xcf   : > { %vm868_vm1 = vcmp.eq.s32.totalorder %v3661_v26, %v846_v22 }
  0xd0   : > { %vm876_vm8 = vmor %vm836_vm7, %vm868_vm1  ;;  %vm910_vm1 = vcmp.eq.s32.totalorder %v3661_v26, %v892_v23 }
  0xd3   : > { %v886_v25 = vpop.permute.xlu1 %885 }
  0xd4   : > { %v3101_v35 = vpop.f32.mrf.mxu0  ;;  %vm908_vm4 = vcmp.eq.s32.totalorder %v3661_v26, %v886_v25 }
  0xd5   : > { %v596_v40 = vadd.f32 %v3101_v35, %v2888_v37  ;;  %vm916_vm9 = vmor %vm876_vm8, %vm908_vm4 }
  0xd6   : > { %v587_v38 = vpop.f32.mrf.mxu0  ;;  %vm956_vm11 = vmor %vm916_vm9, %vm948_vm5  ;;  %vm951_vm5 = vcmp.eq.s32.totalorder %v3661_v26, %v935_v21 }
  0xd7   : > { %v588_v44 = vadd.f32 %v2888_v37, %v587_v38  ;;  %v889_v28 = vpop.permute.xlu1 %888  ;;  %v964_v32 = vsel %vm956_vm11, 1.0, %v3500_v30 }
  0xd8   : > { %v3102_v39 = vpop.f32.mrf.mxu0  ;;  %vm909_vm2 = vcmp.eq.s32.totalorder %v3661_v26, %v889_v28 }
  0xd9   : > { %v599_v41 = vadd.f32 %v3102_v39, %v2888_v37  ;;  %vm917_vm6 = vmor %vm877_vm0, %vm909_vm2 }
  0xda   : > { %v590_v42 = vpop.f32.mrf.mxu0 }
  0xdb   : > { %v591_v45 = vadd.f32 %v2888_v37, %v590_v42  ;;  %v635_v46 = vpack.c.bf16 %v599_v41, %v596_v40  ;;  %v823_v37 = vpop.permute.xlu0 %822 }
  0xdc   : > { %v929_v31 = vpop.permute.xlu1 %928  ;;  %vm839_vm15 = vcmp.eq.s32.totalorder %v3661_v26, %v823_v37  ;;  %v3308_v37 = vld [vmem:[%s4359_s8 + $0x28] sm:$0xff]  }
  0xdd   : > { %v634_v47 = vpack.c.bf16 %v591_v45, %v588_v44  ;;  %3103 = vmatprep.subr.bf16.mxu1 %v635_v46  ;;  %vm949_vm10 = vcmp.eq.s32.totalorder %v3661_v26, %v929_v31  ;;  %v3302_v31 = vld [vmem:[%s4357_s6 + $0x14] ss:$8 sps:$4 sm:$0xff]  }
  0xde   : > { %3104 = vmatpush3.bf16.msra.mxu1 %v635_v46  ;;  %vm957_vm12 = vmor %vm917_vm6, %vm949_vm10 }
  0xdf   : > { %3105 = vmatprep.subr.bf16.mxu1 %v634_v47  ;;  %v965_v33 = vsel %vm957_vm12, 1.0, %v3500_v30  ;;  %v832_v45 = vpop.permute.xlu0 %831 }
  0xe0   : > { %v3249_v35 = vpack.i.bf16 %v965_v33, %v964_v32  ;;  %v3300_v32 = vld [vmem:[%s4357_s6 + $0x10] ss:$8 sps:$4 sm:$0xff]   ;;  %v3305_v33 = vld [vmem:[%s4357_s6 + $0x4] ss:$8 sps:$4 sm:$0xff]  }
  0xe1   : > { %v820_v34 = vpop.permute.xlu1 %819 }
  0xe2   : > { %3106 = vmatpush3.bf16.msra.mxu1 %v634_v47  ;;  %3250 = vrot.lane.b32.xlu1 %v3249_v35, %s3502_s28  ;;  %vm838_vm13 = vcmp.eq.s32.totalorder %v3661_v26, %v820_v34  ;;  %v3303_v34 = vld [vmem:[%s4357_s6] ss:$8 sps:$4 sm:$0xff]   ;;  %v3306_v35 = vld [vmem:[%s4359_s8 + $0x38] sm:$0xff]  }
  0xe3   : > { %v858_v47 = vpop.permute.xlu0 %857  ;;  %1176 = vmatprep.subr.bf16.mxu1 %v3296_v51 }
  0xe5   : > { %3108 = vmatmul.mubr.msk.bf16.vlgmr.msra.gmra.mxu1 %vm636_vm3, %v633_v52  ;;  %v3299_v52 = vld [vmem:[%s4357_s6 + $0x24] ss:$8 sps:$4 sm:$0xff]  }
  0xe6   : > { %1200 = vmatprep.mubr.bf16.mxu1 %v3495_v17  ;;  %v852_v36 = vpop.permute.xlu1 %851  ;;  %1177 = vmatpush1.bf16.msra.mxu1 %v3294_v50 }
  0xe7   : > { %vm870_vm14 = vcmp.eq.s32.totalorder %v3661_v26, %v852_v36  ;;  %1178 = vmatprep.subr.bf16.mxu1 %v3299_v52  ;;  %v867_v60 = vpop.permute.xlu0 %866  ;;  %v3307_v36 = vld [vmem:[%s4359_s8 + $0x30] sm:$0xff]  }
  0xe8   : > { %vm878_vm2 = vmor %vm838_vm13, %vm870_vm14  ;;  %vm872_vm13 = vcmp.eq.s32.totalorder %v3661_v26, %v858_v47 }
  0xe9   : > { %vm918_vm7 = vmor %vm878_vm2, %vm910_vm1 }
  0xea   : > { %v855_v38 = vpop.permute.xlu1 %854  ;;  %1179 = vmatpush1.bf16.msra.mxu1 %v3297_v54 }
  0xeb   : > { %vm871_vm0 = vcmp.eq.s32.totalorder %v3661_v26, %v855_v38  ;;  %v944_v4 = vpop.permute.xlu0 %943  ;;  %1180 = vmatprep.subr.bf16.mxu1 %v3302_v31  ;;  %v3309_v38 = vld [vmem:[%s4359_s8 + $0x20] sm:$0xff]  }
  0xec   : > { %vm879_vm4 = vmor %vm839_vm15, %vm871_vm0 }
  0xee   : > { %1181 = vmatpush1.bf16.msra.mxu1 %v3300_v32 }
  0xef   : > { %v895_v39 = vpop.permute.xlu1 %894  ;;  %1182 = vmatprep.subr.bf16.mxu1 %v3305_v33 }
  0xf0   : > { %vm911_vm6 = vcmp.eq.s32.totalorder %v3661_v26, %v895_v39  ;;  %v3310_v39 = vld [vmem:[%s4359_s8 + $0x18] sm:$0xff]  }
  0xf1   : > { %vm919_vm8 = vmor %vm879_vm4, %vm911_vm6  ;;  %vm913_vm4 = vcmp.eq.s32.totalorder %v3661_v26, %v3764_v27 }
  0xf2   : > { %vm959_vm9 = vmor %vm919_vm8, %vm951_vm5  ;;  %1183 = vmatpush1.bf16.msra.mxu1 %v3303_v34 }
  0xf3   : > { %v967_v41 = vsel %vm959_vm9, 1.0, %v3500_v30 }
  0xf4   : > { %v932_v40 = vpop.permute.xlu1 %931 }
  0xf5   : > { %vm950_vm10 = vcmp.eq.s32.totalorder %v3661_v26, %v932_v40  ;;  %v3311_v40 = vld [vmem:[%s4359_s8 + $0x10] sm:$0xff]  }
  0xf6   : > { %vm958_vm11 = vmor %vm918_vm7, %vm950_vm10 }
  0xf7   : > { %v966_v42 = vsel %vm958_vm11, 1.0, %v3500_v30  ;;  %vm842_vm11 = vcmp.eq.s32.totalorder %v3661_v26, %v832_v45 }
  0xf8   : > { %v3254_v43 = vpack.i.bf16 %v967_v41, %v966_v42  ;;  %v3312_v41 = vld [vmem:[%s4359_s8 + $0x8] sm:$0xff]  }
  0xf9   : > { %v826_v44 = vpop.permute.xlu1 %825 }
  0xfa   : > { %3255 = vrot.lane.b32.xlu0 %v3254_v43, %s3502_s28  ;;  %vm840_vm12 = vcmp.eq.s32.totalorder %v3661_v26, %v826_v44 }
  0xfb   : > { %vm880_vm14 = vmor %vm840_vm12, %vm872_vm13 }
  0xfd   : > { %v829_v46 = vpop.permute.xlu1 %828 }
  0xfe   : > { %vm841_vm15 = vcmp.eq.s32.totalorder %v3661_v26, %v829_v46 }
 0x102   : > { %v861_v48 = vpop.permute.xlu1 %860 }
 0x103   : > { %vm873_vm0 = vcmp.eq.s32.totalorder %v3661_v26, %v861_v48 }
 0x104   : > { %vm881_vm5 = vmor %vm841_vm15, %vm873_vm0  ;;  %vm875_vm0 = vcmp.eq.s32.totalorder %v3661_v26, %v867_v60 }
 0x105   : > { %vm921_vm8 = vmor %vm881_vm5, %vm913_vm4 }
 0x107   : > { %v898_v49 = vpop.permute.xlu1 %897 }
 0x108   : > { %vm912_vm1 = vcmp.eq.s32.totalorder %v3661_v26, %v898_v49 }
 0x109   : > { %vm920_vm2 = vmor %vm880_vm14, %vm912_vm1 }
 0x10c   : > { %v938_v53 = vpop.permute.xlu1 %937 }
 0x10d   : > { %vm952_vm6 = vcmp.eq.s32.totalorder %v3661_v26, %v938_v53 }
 0x10e   : > { %vm960_vm7 = vmor %vm920_vm2, %vm952_vm6  ;;  %vm954_vm2 = vcmp.eq.s32.totalorder %v3661_v26, %v944_v4 }
 0x10f   : > { %v968_v56 = vsel %vm960_vm7, 1.0, %v3500_v30 }
 0x110   : > { %v941_v55 = vpop.permute.xlu1 %940 }
 0x111   : > { %vm953_vm9 = vcmp.eq.s32.totalorder %v3661_v26, %v941_v55 }
 0x112   : > { %vm961_vm10 = vmor %vm921_vm8, %vm953_vm9 }
 0x113   : > { %v969_v57 = vsel %vm961_vm10, 1.0, %v3500_v30  ;;  %vm726_vm10 = vcmp.eq.s32.totalorder %v3661_v26, %v3730_v62 }
 0x114   : > { %v3259_v58 = vpack.i.bf16 %v969_v57, %v968_v56  ;;  %v734_v20 = vsel %vm726_vm10, 1.0, %v3500_v30 }
 0x115   : > { %v835_v59 = vpop.permute.xlu1 %834 }
 0x116   : > { %3260 = vrot.lane.b32.xlu1 %v3259_v58, %s3502_s28  ;;  %vm843_vm14 = vcmp.eq.s32.totalorder %v3661_v26, %v835_v59 }
 0x117   : > { %vm883_vm4 = vmor %vm843_vm14, %vm875_vm0  ;;  %vm730_vm14 = vcmp.eq.s32.totalorder %v3661_v26, %v3754_v13  ;;  %vm731_vm0 = vcmp.eq.s32.totalorder %v3661_v26, %v3758_v15 }
 0x118   : > { %v738_v27 = vsel %vm730_vm14, 1.0, %v3500_v30  ;;  %v739_v13 = vsel %vm731_vm0, 1.0, %v3500_v30 }
 0x11a   : > { %v864_v1 = vpop.permute.xlu1 %863 }
 0x11b   : > { %vm874_vm12 = vcmp.eq.s32.totalorder %v3661_v26, %v864_v1 }
 0x11c   : > { %vm882_vm13 = vmor %vm842_vm11, %vm874_vm12  ;;  %vm727_vm11 = vcmp.eq.s32.totalorder %v3661_v26, %v3737_v0  ;;  %vm767_vm12 = vcmp.eq.s32.totalorder %v3661_v26, %v3741_v2 }
 0x11d   : > { %v735_v21 = vsel %vm727_vm11, 1.0, %v3500_v30  ;;  %v775_v62 = vsel %vm767_vm12, 1.0, %v3500_v30 }
 0x11f   : > { %v904_v3 = vpop.permute.xlu1 %903 }
 0x120   : > { %vm914_vm15 = vcmp.eq.s32.totalorder %v3661_v26, %v904_v3 }
 0x121   : > { %vm922_vm1 = vmor %vm882_vm13, %vm914_vm15  ;;  %vm766_vm13 = vcmp.eq.s32.totalorder %v3661_v26, %v3735_v63  ;;  %v783_v63 = vsub.f32 %v735_v21, %v775_v62  ;;  %vm770_vm15 = vcmp.eq.s32.totalorder %v3661_v26, %v3756_v14 }
 0x122   : > { %vm962_vm6 = vmor %vm922_vm1, %vm954_vm2  ;;  %v774_v22 = vsel %vm766_vm13, 1.0, %v3500_v30  ;;  %vm771_vm1 = vcmp.eq.s32.totalorder %v3661_v26, %v3760_v18  ;;  %v778_v28 = vsel %vm770_vm15, 1.0, %v3500_v30  ;;  %vm1155_vm2 = vcmask 523264  }
 0x123   : > { %v907_v5 = vpop.permute.xlu1 %906  ;;  %v970_v7 = vsel %vm962_vm6, 1.0, %v3500_v30  ;;  %v782_v23 = vsub.f32 %v734_v20, %v774_v22  ;;  %v779_v29 = vsel %vm771_vm1, 1.0, %v3500_v30  ;;  %v786_v14 = vsub.f32 %v738_v27, %v778_v28 }
 0x124   : > { %vm915_vm5 = vcmp.eq.s32.totalorder %v3661_v26, %v907_v5  ;;  %v787_v15 = vsub.f32 %v739_v13, %v779_v29  ;;  %v3967_v27 = vshrl.u32 %v606_v24, 7  ;;  %v1103_v29 = vld [vmem:[%s4358_s7] sm:$0x3] }
 0x125   : > { %vm923_vm7 = vmor %vm883_vm4, %vm915_vm5  ;;  %v3853_v25 = vpack.c.bf16 %v783_v63, %v782_v23  ;;  %v3314_v63 = vld [vmem:[%s4359_s8 + $0x48] sm:$0xff]   ;;  %v3315_v23 = vld [vmem:[%s4359_s8 + $0x40] sm:$0xff]  }
 0x126   : > { %v3864_v18 = vpack.c.bf16 %v787_v15, %v786_v14  ;;  %v1111_v28 = vsub.s32 1, %v3967_v27  ;;  %v1107_v13 = vsub.s32 0, %v3967_v27 }
 0x128   : > { %v947_v6 = vpop.permute.xlu1 %946  ;;  %v1112_v15 = vrot.slane %v1103_v29, %v1111_v28  ;;  %v1108_v31 = vrot.slane %v1103_v29, %v1107_v13 }
 0x129   : > { %vm955_vm8 = vcmp.eq.s32.totalorder %v3661_v26, %v947_v6 }
 0x12a   : > { %vm963_vm9 = vmor %vm923_vm7, %vm955_vm8 }
 0x12b   : > { %v971_v8 = vsel %vm963_vm9, 1.0, %v3500_v30 }
 0x12c   : > { %v3264_v9 = vpack.i.bf16 %v971_v8, %v970_v7 }
 0x12e   : > { %3265 = vrot.lane.b32.xlu0 %v3264_v9, %s3502_s28 }
 0x154   : > { %v3908_v43 = vpop.permute.xlu1 %3250 }
 0x155   : > { %v3253_v46 = vunpack.i.h.bf16 %v3908_v43  ;;  %v3252_v47 = vunpack.i.l.bf16 %v3908_v43 }
 0x16c   : > { %v3918_v51 = vpop.permute.xlu0 %3255 }
 0x16d   : > { %v3258_v55 = vunpack.i.h.bf16 %v3918_v51  ;;  %v3257_v56 = vunpack.i.l.bf16 %v3918_v51 }
 0x188   : > { %v3930_v60 = vpop.permute.xlu1 %3260 }
 0x189   : > { %v3263_v4 = vunpack.i.h.bf16 %v3930_v60  ;;  %v3262_v5 = vunpack.i.l.bf16 %v3930_v60  ;;  %v3339_v60 = vld [vmem:[%s4359_s8 + $0x50] sm:$0xff]  }
 0x1a0   : > { %v3942_v8 = vpop.permute.xlu0 %3265 }
 0x1a1   : > { %v3267_v20 = vunpack.i.l.bf16 %v3942_v8 }
 0x1a5   : > { %v3821_v10 = vpop.f32.mrf.mxu1 }
 0x1a7   : > { %v3823_v11 = vpop.f32.mrf.mxu1 }
 0x1a9   : > { %v3833_v16 = vpop.f32.mrf.mxu1 }
 0x1aa   : > { %v973_v19 = vpack.c.bf16 %v3833_v16, %v3821_v10 }
 0x1ab   : > { %v3841_v0 = vpop.f32.mrf.mxu1 }
 0x1ac   : > { %v972_v2 = vpack.c.bf16 %v3841_v0, %v3823_v11  ;;  %3111 = vmatprep.subr.bf16.mxu0 %v973_v19 }
 0x1ad   : > { %3112 = vmatpush3.bf16.msra.mxu0 %v973_v19  ;;  %v3268_v19 = vunpack.i.h.bf16 %v3942_v8  ;;  %v2963_v8 = vld [vmem:[%s4358_s7 + $0x2] sm:$0x3] }
 0x1ae   : > { %3113 = vmatprep.subr.bf16.mxu0 %v972_v2 }
 0x1b1   : > { %3114 = vmatpush3.bf16.msra.mxu0 %v972_v2  ;;  %v3313_v2 = vld [vmem:[%s4359_s8] sm:$0xff]  }
 0x1b2   : > { %1364 = vmatprep.subr.bf16.mxu0 %v3495_v17 }
 0x1b4   : > { %3116 = vmatmul.mubr.msk.bf16.vlgmr.msra.gmra.mxu0 %vm636_vm3, %v3853_v25 }
 0x1b5   : > { %3119 = vmatprep.mubr.msk.bf16.mxu0 %vm636_vm3, %v3752_v12  ;;  %1365 = vmatpush1.bf16.msra.mxu0 %v3306_v35 }
 0x1b6   : > { %1366 = vmatprep.subr.bf16.mxu0 %v3495_v17 }
 0x1b9   : > { %1367 = vmatpush1.bf16.msra.mxu0 %v3307_v36 }
 0x1ba   : > { %1368 = vmatprep.subr.bf16.mxu0 %v3495_v17 }
 0x1bc   : > { %3120 = vmatmul.mubr.msk.bf16.gmra.mxu0 %vm636_vm3, %v3864_v18 }
 0x1bd   : > { %1369 = vmatpush1.bf16.msra.mxu0 %v3308_v37 }
 0x1be   : > { %1370 = vmatprep.subr.bf16.mxu0 %v3495_v17 }
 0x1c1   : > { %1371 = vmatpush1.bf16.msra.mxu0 %v3309_v38 }
 0x1c2   : > { %1372 = vmatprep.subr.bf16.mxu0 %v3495_v17 }
 0x1c5   : > { %1373 = vmatpush1.bf16.msra.mxu0 %v3310_v39 }
 0x1c6   : > { %1374 = vmatprep.subr.bf16.mxu0 %v3495_v17 }
 0x1c9   : > { %1375 = vmatpush1.bf16.msra.mxu0 %v3311_v40 }
 0x1ca   : > { %1376 = vmatprep.subr.bf16.mxu0 %v3495_v17 }
 0x1cd   : > { %1377 = vmatpush1.bf16.msra.mxu0 %v3312_v41 }
 0x1ce   : > { %1378 = vmatprep.subr.bf16.mxu0 %v3495_v17 }
 0x1d1   : > { %1379 = vmatpush1.bf16.msra.mxu0 %v3313_v2 }
 0x1d2   : > { %1392 = vmatprep.subr.bf16.mxu0 %v3495_v17 }
 0x1d5   : > { %1393 = vmatpush2.bf16.msra.mxu0 %v3314_v63 }
 0x1d6   : > { %1394 = vmatprep.subr.bf16.mxu0 %v3495_v17 }
 0x1d9   : > { %1395 = vmatpush2.bf16.msra.mxu0 %v3315_v23 }
 0x274   : > { %v3117_v42 = vpop.f32.mrf.mxu0 }
 0x275   : > { %v1085_v59 = vsel %vm636_vm3, %v3117_v42, %v3257_v56 }
 0x276   : > { %v1020_v44 = vpop.f32.mrf.mxu0 }
 0x277   : > { %v1083_v49 = vsel %vm636_vm3, %v1020_v44, %v3252_v47 }
 0x278   : > { %v3118_v45 = vpop.f32.mrf.mxu0 }
 0x279   : > { %v1086_v57 = vsel %vm636_vm3, %v3118_v45, %v3258_v55 }
 0x27a   : > { %v1023_v48 = vpop.f32.mrf.mxu0  ;;  %v1100_v1 = vpack.c.bf16 %v1086_v57, %v1085_v59 }
 0x27b   : > { %v1084_v50 = vsel %vm636_vm3, %v1023_v48, %v3253_v46 }
 0x27c   : > { %v1099_v52 = vpack.c.bf16 %v1084_v50, %v1083_v49  ;;  %v3121_v53 = vpop.f32.mrf.mxu0 }
 0x27d   : > { %v1089_v62 = vsel %vm636_vm3, %v3121_v53, %v3267_v20 }
 0x27e   : > { %v1036_v54 = vpop.f32.mrf.mxu0  ;;  %2911 = vmatmul.mubr.msk.bf16.vlgmr.msra.gmra.mxu1 %vm1155_vm2, %v1099_v52 }
 0x27f   : > { %1210 = vmatprep.mubr.bf16.mxu1 %v3495_v17  ;;  %v1087_v7 = vsel %vm636_vm3, %v1036_v54, %v3262_v5 }
 0x280   : > { %v3122_v58 = vpop.f32.mrf.mxu0 }
 0x281   : > { %v1090_v21 = vsel %vm636_vm3, %v3122_v58, %v3268_v19 }
 0x282   : > { %v1039_v3 = vpop.f32.mrf.mxu0  ;;  %v1102_v22 = vpack.c.bf16 %v1090_v21, %v1089_v62 }
 0x283   : > { %v1088_v6 = vsel %vm636_vm3, %v1039_v3, %v3263_v4 }
 0x284   : > { %v1101_v9 = vpack.c.bf16 %v1088_v6, %v1087_v7 }
 0x286   : > { %2912 = vmatmul.mubr.msk.bf16.gmra.mxu1 %vm1155_vm2, %v1100_v1 }
 0x287   : > { %1220 = vmatprep.mubr.bf16.mxu1 %v3495_v17 }
 0x28e   : > { %2913 = vmatmul.mubr.msk.bf16.gmra.mxu1 %vm1155_vm2, %v1101_v9 }
 0x28f   : > { %1230 = vmatprep.mubr.bf16.mxu1 %v3495_v17 }
 0x296   : > { %2914 = vmatmul.mubr.msk.bf16.gmra.mxu1 %vm1155_vm2, %v1102_v22 }
 0x33e   : > { %v1202_v14 = vpop.f32.mrf.mxu1 }
 0x33f   : > { %v1203_v35 = vadd.f32 %v1202_v14, %v1108_v31 }
 0x340   : > { %v1204_v32 = vpop.f32.mrf.mxu1 }
 0x341   : > { %v1205_v34 = vadd.f32 %v1204_v32, %v1112_v15  ;;  %v1241_v42 = vmax.f32 %v1203_v35, 0.0 }
 0x342   : > { %v1206_v33 = vpop.f32.mrf.mxu1 }
 0x343   : > { %v1207_v24 = vadd.f32 %v1206_v33, %v1108_v31  ;;  %v1242_v40 = vmax.f32 %v1205_v34, 0.0 }
 0x344   : > { %v1208_v36 = vpop.f32.mrf.mxu1 }
 0x345   : > { %v1209_v37 = vadd.f32 %v1208_v36, %v1112_v15  ;;  %v1243_v38 = vmax.f32 %v1207_v24, 0.0 }
 0x346   : > { %v1212_v39 = vpop.f32.mrf.mxu1 }
 0x347   : > { %v1244_v41 = vmax.f32 %v1209_v37, 0.0  ;;  %v1277_v48 = vpack.c.bf16 %v1243_v38, %v1241_v42  ;;  %v1213_v53 = vadd.f32 %v1212_v39, %v1108_v31 }
 0x348   : > { %v1214_v44 = vpop.f32.mrf.mxu1 }
 0x349   : > { %v1278_v45 = vpack.c.bf16 %v1244_v41, %v1242_v40  ;;  %v1215_v50 = vadd.f32 %v1214_v44, %v1112_v15  ;;  %v1245_v6 = vmax.f32 %v1213_v53, 0.0 }
 0x34a   : > { %v1216_v49 = vpop.f32.mrf.mxu1 }
 0x34b   : > { %v1217_v52 = vadd.f32 %v1216_v49, %v1108_v31  ;;  %2926 = vmatprep.mubr.msk.bf16.mxu0 %vm636_vm3, %v1278_v45  ;;  %v1246_v1 = vmax.f32 %v1215_v50, 0.0 }
 0x34c   : > { %v1218_v54 = vpop.f32.mrf.mxu1  ;;  %1397 = vmatmul.mubr.bf16.vlgmr.msra.gmra.mxu0 %v1277_v48 }
 0x34d   : > { %v1219_v57 = vadd.f32 %v1218_v54, %v1112_v15  ;;  %v1247_v58 = vmax.f32 %v1217_v52, 0.0 }
 0x34e   : > { %v1222_v59 = vpop.f32.mrf.mxu1 }
 0x34f   : > { %v1248_v3 = vmax.f32 %v1219_v57, 0.0  ;;  %v1279_v21 = vpack.c.bf16 %v1247_v58, %v1245_v6  ;;  %v1223_v63 = vadd.f32 %v1222_v59, %v1108_v31 }
 0x350   : > { %v1224_v7 = vpop.f32.mrf.mxu1 }
 0x351   : > { %v1280_v9 = vpack.c.bf16 %v1248_v3, %v1246_v1  ;;  %v1225_v22 = vadd.f32 %v1224_v7, %v1112_v15  ;;  %v1249_v24 = vmax.f32 %v1223_v63, 0.0 }
 0x352   : > { %v1226_v62 = vpop.f32.mrf.mxu1 }
 0x353   : > { %v1227_v2 = vadd.f32 %v1226_v62, %v1108_v31  ;;  %2927 = vmatprep.mubr.msk.bf16.mxu0 %vm636_vm3, %v1280_v9  ;;  %v1250_v33 = vmax.f32 %v1225_v22, 0.0  ;;  %v2915_v9 = vld [vmem:[%s4360_s9] ss:$0 sm:$0xff] }
 0x354   : > { %v1228_v23 = vpop.f32.mrf.mxu1  ;;  %1405 = vmatmul.mubr.bf16.gmra.mxu0 %v1279_v21 }
 0x355   : > { %v1229_v29 = vadd.f32 %v1228_v23, %v1112_v15  ;;  %v1251_v14 = vmax.f32 %v1227_v2, 0.0 }
 0x356   : > { %v1232_v32 = vpop.f32.mrf.mxu1 }
 0x357   : > { %v1252_v34 = vmax.f32 %v1229_v29, 0.0  ;;  %v1281_v37 = vpack.c.bf16 %v1251_v14, %v1249_v24  ;;  %v1233_v41 = vadd.f32 %v1232_v32, %v1108_v31 }
 0x358   : > { %v1234_v35 = vpop.f32.mrf.mxu1 }
 0x359   : > { %v1282_v36 = vpack.c.bf16 %v1252_v34, %v1250_v33  ;;  %v1235_v39 = vadd.f32 %v1234_v35, %v1112_v15  ;;  %v1253_v50 = vmax.f32 %v1233_v41, 0.0 }
 0x35a   : > { %v1236_v38 = vpop.f32.mrf.mxu1 }
 0x35b   : > { %v1237_v40 = vadd.f32 %v1236_v38, %v1108_v31  ;;  %2928 = vmatprep.mubr.msk.bf16.mxu0 %vm636_vm3, %v1282_v36  ;;  %v1254_v48 = vmax.f32 %v1235_v39, 0.0 }
 0x35c   : > { %v1238_v42 = vpop.f32.mrf.mxu1  ;;  %1413 = vmatmul.mubr.bf16.gmra.mxu0 %v1281_v37 }
 0x35d   : > { %v1239_v44 = vadd.f32 %v1238_v42, %v1112_v15  ;;  %v1255_v45 = vmax.f32 %v1237_v40, 0.0 }
 0x35f   : > { %v1256_v49 = vmax.f32 %v1239_v44, 0.0  ;;  %v1283_v53 = vpack.c.bf16 %v1255_v45, %v1253_v50 }
 0x361   : > { %v1284_v52 = vpack.c.bf16 %v1256_v49, %v1254_v48 }
 0x363   : > { %2929 = vmatprep.mubr.msk.bf16.mxu0 %vm636_vm3, %v1284_v52 }
 0x364   : > { %1421 = vmatmul.mubr.bf16.gmra.mxu0 %v1283_v53 }
 0x365   : > { %2001 = vmatprep.mubr.bf16.mxu0 %v3495_v17 }
 0x40c   : > { %v1398_v54 = vpop.f32.mrf.mxu0 }
 0x40d   : > { %v3997_v35 = vadd.f32 %v2915_v9, %v1398_v54 }
 0x40e   : > { %v1400_v57 = vpop.f32.mrf.mxu0 }
 0x40f   : > { %v2930_v41 = vmul.f32 -1.442695, %v3997_v35 }
 0x410   : > { %v1401_v58 = vpop.f32.mrf.mxu0 }
 0x411   : > { %v4003_v42 = vadd.f32 %v2915_v9, %v1401_v58 }
 0x412   : > { %v1403_v59 = vpop.f32.mrf.mxu0 }
 0x413   : > { %v2931_v45 = vmul.f32 -1.442695, %v4003_v42 }
 0x414   : > { %v1406_v1 = vpop.f32.mrf.mxu0 }
 0x415   : > { %v3988_v2 = vadd.f32 %v2915_v9, %v1406_v1 }
 0x416   : > { %v1408_v31 = vpop.f32.mrf.mxu0 }
 0x417   : > { %v2932_v34 = vmul.f32 -1.442695, %v3988_v2 }
 0x418   : > { %v1409_v3 = vpop.f32.mrf.mxu0 }
 0x419   : > { %v4000_v38 = vadd.f32 %v2915_v9, %v1409_v3 }
 0x41a   : > { %v1411_v6 = vpop.f32.mrf.mxu0 }
 0x41b   : > { %v2933_v44 = vmul.f32 -1.442695, %v4000_v38 }
 0x41c   : > { %v1414_v15 = vpop.f32.mrf.mxu0 }
 0x41d   : > { %v3986_v62 = vadd.f32 %v2915_v9, %v1414_v15 }
 0x41e   : > { %v1416_v7 = vpop.f32.mrf.mxu0 }
 0x41f   : > { %v2934_v23 = vmul.f32 -1.442695, %v3986_v62 }
 0x420   : > { %v1417_v21 = vpop.f32.mrf.mxu0 }
 0x421   : > { %v3991_v29 = vadd.f32 %v2915_v9, %v1417_v21  ;;  %3346 = vpow2.f32 %v2934_v23 }
 0x422   : > { %v1419_v22 = vpop.f32.mrf.mxu0 }
 0x423   : > { %v2935_v36 = vmul.f32 -1.442695, %v3991_v29 }
 0x424   : > { %v1422_v63 = vpop.f32.mrf.mxu0 }
 0x425   : > { %v3993_v14 = vadd.f32 %v2915_v9, %v1422_v63 }
 0x426   : > { %v1424_v32 = vpop.f32.mrf.mxu0 }
 0x427   : > { %v2936_v33 = vmul.f32 -1.442695, %v3993_v14 }
 0x428   : > { %v1425_v24 = vpop.f32.mrf.mxu0 }
 0x429   : > { %v1426_v37 = vadd.f32 %v2915_v9, %v1425_v24  ;;  %3348 = vpow2.f32 %v2936_v33 }
 0x42a   : > { %v1427_v39 = vpop.f32.mrf.mxu0  ;;  %3350 = vpow2.f32 %v2932_v34 }
 0x42b   : > { %v2937_v40 = vmul.f32 -1.442695, %v1426_v37  ;;  %3352 = vpow2.f32 %v2935_v36 }
 0x42d   : > { %3354 = vpow2.f32 %v2937_v40 }
 0x42e   : > { %3356 = vpow2.f32 %v2930_v41  ;;  %v3347_v48 = vpop.eup %3346 }
 0x42f   : > { %3358 = vpow2.f32 %v2933_v44  ;;  %v1457_v53 = vadd.f32 1.0, %v3347_v48  ;;  %v2898_v48 = vld [vmem:[%s513_s18] ss:$0 sm:$0xff] }
 0x430   : > { %3360 = vpow2.f32 %v2931_v45  ;;  %v794_v45 = vadd.s32 8, %v3967_v27  ;;  %vm802_vm4 = vcmp.eq.s32.totalorder %v3967_v27, %v2898_v48 }
 0x432   : > { %vm803_vm5 = vcmp.eq.s32.totalorder %v794_v45, %v2898_v48 }
 0x436   : > { %v3349_v49 = vpop.eup %3348 }
 0x437   : > { %v1459_v50 = vadd.f32 1.0, %v3349_v49  ;;  %v3351_v52 = vpop.eup %3350 }
 0x438   : > { %v3353_v54 = vpop.eup %3352  ;;  %v1455_v1 = vadd.f32 1.0, %v3351_v52 }
 0x439   : > { %3362 = vrcp.f32 %v1459_v50  ;;  %v1458_v31 = vadd.f32 1.0, %v3353_v54  ;;  %v807_v54 = vsel %vm803_vm5, 1.0, %v3500_v30 }
 0x43a   : > { %v3355_v57 = vpop.eup %3354  ;;  %3364 = vrcp.f32 %v1457_v53  ;;  %v806_v53 = vsel %vm802_vm4, 1.0, %v3500_v30 }
 0x43b   : > { %v1460_v59 = vadd.f32 1.0, %v3355_v57  ;;  %v3357_v58 = vpop.eup %3356  ;;  %v4027_v57 = vpack.c.bf16 %v807_v54, %v806_v53 }
 0x43c   : > { %v3359_v3 = vpop.eup %3358  ;;  %v1453_v6 = vadd.f32 1.0, %v3357_v58 }
 0x43d   : > { %3366 = vrcp.f32 %v1460_v59  ;;  %v1456_v15 = vadd.f32 1.0, %v3359_v3  ;;  %v3361_v7 = vpop.eup %3360  ;;  %3131 = vmatprep.mubr.msk.bf16.mxu1 %vm1155_vm2, %v4027_v57 }
 0x43e   : > { %3368 = vrcp.f32 %v1455_v1  ;;  %v1454_v9 = vadd.f32 1.0, %v3361_v7  ;;  %v3269_v7 = vpack.i.bf16 %v3841_v0, %v3823_v11 }
 0x43f   : > { %3370 = vrcp.f32 %v1458_v31 }
 0x440   : > { %3372 = vrcp.f32 %v1453_v6 }
 0x441   : > { %3374 = vrcp.f32 %v1456_v15 }
 0x442   : > { %3376 = vrcp.f32 %v1454_v9 }
 0x446   : > { %v3363_v21 = vpop.eup %3362 }
 0x447   : > { %1497 = vrot.lane.b32.xlu1 %v3363_v21, %s3502_s28  ;;  %v3365_v22 = vpop.eup %3364 }
 0x44a   : > { %v3367_v63 = vpop.eup %3366 }
 0x44b   : > { %1499 = vrot.lane.b32.xlu0 %v3367_v63, %s3502_s28  ;;  %1493 = vrot.lane.b32.xlu1 %v3365_v22, %s3502_s28  ;;  %v3369_v23 = vpop.eup %3368 }
 0x44c   : > { %v3371_v32 = vpop.eup %3370 }
 0x44d   : > { %v3373_v33 = vpop.eup %3372 }
 0x44e   : > { %v3375_v34 = vpop.eup %3374 }
 0x44f   : > { %1495 = vrot.lane.b32.xlu0 %v3371_v32, %s3502_s28  ;;  %1489 = vrot.lane.b32.xlu1 %v3369_v23, %s3502_s28  ;;  %v3377_v24 = vpop.eup %3376  ;;  %v3316_v32 = vld [vmem:[%s4361_s10 + $0x18] sm:$0xff]  }
 0x453   : > { %1491 = vrot.lane.b32.xlu0 %v3375_v34, %s3502_s28  ;;  %1485 = vrot.lane.b32.xlu1 %v3373_v33, %s3502_s28 }
 0x457   : > { %1487 = vrot.lane.b32.xlu0 %v3377_v24, %s3502_s28  ;;  %v3317_v24 = vld [vmem:[%s4361_s10 + $0x10] sm:$0xff]  }
 0x4b9   : > { %v1498_v36 = vpop.permute.xlu1 %1497 }
 0x4ba   : > { %v1515_v41 = vmul.f32 %v1498_v36, %v3993_v14  ;;  %v3318_v36 = vld [vmem:[%s4361_s10 + $0x8] sm:$0xff]  }
 0x4bd   : > { %v1500_v39 = vpop.permute.xlu0 %1499  ;;  %v1494_v40 = vpop.permute.xlu1 %1493 }
 0x4be   : > { %v1516_v44 = vmul.f32 %v1500_v39, %v1426_v37  ;;  %v1513_v14 = vmul.f32 %v1494_v40, %v3986_v62  ;;  %v3319_v39 = vld [vmem:[%s4361_s10] sm:$0xff]  }
 0x4c0   : > { %v1520_v49 = vpack.c.bf16 %v1516_v44, %v1515_v41 }
 0x4c1   : > { %v1496_v50 = vpop.permute.xlu0 %1495  ;;  %v1490_v52 = vpop.permute.xlu1 %1489 }
 0x4c2   : > { %v1514_v37 = vmul.f32 %v1496_v50, %v3991_v29  ;;  %1531 = vrot.lane.b32.xlu1 %v1520_v49, %s3503_s13  ;;  %v1511_v58 = vmul.f32 %v1490_v52, %v3988_v2  ;;  %v3274_v2 = vpack.i.bf16 %v3833_v16, %v3821_v10 }
 0x4c4   : > { %v1519_v59 = vpack.c.bf16 %v1514_v37, %v1513_v14 }
 0x4c5   : > { %v1492_v1 = vpop.permute.xlu0 %1491  ;;  %v1486_v3 = vpop.permute.xlu1 %1485 }
 0x4c6   : > { %v1512_v31 = vmul.f32 %v1492_v1, %v4000_v38  ;;  %1529 = vrot.lane.b32.xlu0 %v1519_v59, %s3503_s13  ;;  %v1509_v29 = vmul.f32 %v1486_v3, %v3997_v35  ;;  %v795_v35 = vadd.s32 16, %v3967_v27  ;;  %v2940_v3 = vld [vmem:[%s4362_s11] ss:$0 sm:$0xff] }
 0x4c8   : > { %v1518_v62 = vpack.c.bf16 %v1512_v31, %v1511_v58  ;;  %vm804_vm6 = vcmp.eq.s32.totalorder %v795_v35, %v2898_v48 }
 0x4c9   : > { %v1488_v6 = vpop.permute.xlu0 %1487  ;;  %v808_v63 = vsel %vm804_vm6, 1.0, %v3500_v30 }
 0x4ca   : > { %v1510_v15 = vmul.f32 %v1488_v6, %v4003_v42  ;;  %1527 = vrot.lane.b32.xlu1 %v1518_v62, %s3503_s13  ;;  %v796_v42 = vadd.s32 24, %v3967_v27 }
 0x4cc   : > { %v1517_v9 = vpack.c.bf16 %v1510_v15, %v1509_v29  ;;  %vm805_vm7 = vcmp.eq.s32.totalorder %v796_v42, %v2898_v48 }
 0x4cd   : > { %v809_v23 = vsel %vm805_vm7, 1.0, %v3500_v30 }
 0x4ce   : > { %3270 = vrot.lane.b32.xlu1 %v3269_v7, %s3502_s28  ;;  %1525 = vrot.lane.b32.xlu0 %v1517_v9, %s3503_s13  ;;  %v4051_v34 = vpack.c.bf16 %v809_v23, %v808_v63 }
 0x4d2   : > { %3275 = vrot.lane.b32.xlu0 %v3274_v2, %s3502_s28 }
 0x534   : > { %v1532_v38 = vpop.permute.xlu1 %1531 }
 0x535   : > { %3123 = vmatprep.subr.bf16.mxu1 %v1532_v38 }
 0x536   : > { %3124 = vmatpush3.bf16.msra.mxu1 %v1532_v38 }
 0x538   : > { %v1530_v21 = vpop.permute.xlu0 %1529 }
 0x539   : > { %3125 = vmatprep.subr.bf16.mxu1 %v1530_v21 }
 0x53a   : > { %3126 = vmatpush3.bf16.msra.mxu1 %v1530_v21 }
 0x53c   : > { %v1528_v22 = vpop.permute.xlu1 %1527 }
 0x53d   : > { %3127 = vmatprep.subr.bf16.mxu1 %v1528_v22 }
 0x53e   : > { %3128 = vmatpush3.bf16.msra.mxu1 %v1528_v22 }
 0x540   : > { %v1526_v33 = vpop.permute.xlu0 %1525  ;;  %v3271_v44 = vpop.permute.xlu1 %3270 }
 0x541   : > { %3129 = vmatprep.subr.bf16.mxu1 %v1526_v33  ;;  %v3273_v50 = vunpack.i.h.bf16 %v3271_v44  ;;  %v3272_v52 = vunpack.i.l.bf16 %v3271_v44 }
 0x542   : > { %3130 = vmatpush3.bf16.msra.mxu1 %v1526_v33 }
 0x543   : > { %3135 = vmatprep.subr.bf16.mxu1 %v3316_v32 }
 0x544   : > { %v3276_v41 = vpop.permute.xlu0 %3275 }
 0x545   : > { %3132 = vmatmul.mubr.msk.bf16.vlgmr.msra.gmra.mxu1 %vm1155_vm2, %v4051_v34  ;;  %v3278_v48 = vunpack.i.h.bf16 %v3276_v41  ;;  %v3277_v53 = vunpack.i.l.bf16 %v3276_v41 }
 0x546   : > { %3136 = vmatpush3.bf16.msra.mxu1 %v3316_v32 }
 0x547   : > { %3137 = vmatprep.subr.bf16.mxu1 %v3317_v24 }
 0x54a   : > { %3138 = vmatpush3.bf16.msra.mxu1 %v3317_v24 }
 0x54b   : > { %3139 = vmatprep.subr.bf16.mxu1 %v3318_v36 }
 0x54e   : > { %3140 = vmatpush3.bf16.msra.mxu1 %v3318_v36 }
 0x54f   : > { %3141 = vmatprep.subr.bf16.mxu1 %v3319_v39 }
 0x552   : > { %3142 = vmatpush3.bf16.msra.mxu1 %v3319_v39 }
 0x605   : > { %v3133_v40 = vpop.f32.mrf.mxu1 }
 0x606   : > { %v1610_v1 = vsel %vm636_vm3, %v3133_v40, %v3277_v53 }
 0x607   : > { %v1577_v45 = vpop.f32.mrf.mxu1 }
 0x608   : > { %v1608_v37 = vsel %vm636_vm3, %v1577_v45, %v3272_v52 }
 0x609   : > { %v3134_v49 = vpop.f32.mrf.mxu1 }
 0x60a   : > { %v1611_v54 = vsel %vm636_vm3, %v3134_v49, %v3278_v48 }
 0x60b   : > { %v1580_v14 = vpop.f32.mrf.mxu1  ;;  %v1621_v31 = vpack.c.bf16 %v1611_v54, %v1610_v1 }
 0x60c   : > { %v1609_v59 = vsel %vm636_vm3, %v1580_v14, %v3273_v50 }
 0x60d   : > { %v1620_v58 = vpack.c.bf16 %v1609_v59, %v1608_v37 }
 0x60f   : > { %3143 = vmatprep.mubr.msk.bf16.mxu1 %vm1155_vm2, %v1620_v58 }
 0x610   : > { %3144 = vmatmul.mubr.msk.bf16.vlgmr.msra.gmra.mxu1 %vm1155_vm2, %v1621_v31 }
 0x611   : > { %3151 = vmatprep.mubr.msk.bf16.mxu1 %vm636_vm3, %v3728_v61 }
 0x6d0   : > { %v3145_v62 = vpop.f32.mrf.mxu1 }
 0x6d1   : > { %v1702_v6 = vadd.f32 %v3145_v62, %v2940_v3 }
 0x6d2   : > { %v1693_v29 = vpop.f32.mrf.mxu1 }
 0x6d3   : > { %3378 = vtanh.f32 %v1702_v6  ;;  %v1694_v15 = vadd.f32 %v2940_v3, %v1693_v29  ;;  %v2949_v22 = vmul.f32 -1.442695, %v1702_v6 }
 0x6d4   : > { %v3146_v7 = vpop.f32.mrf.mxu1 }
 0x6d5   : > { %v1705_v9 = vadd.f32 %v3146_v7, %v2940_v3  ;;  %3380 = vtanh.f32 %v1694_v15  ;;  %v2947_v63 = vmul.f32 -1.442695, %v1694_v15 }
 0x6d6   : > { %v1696_v2 = vpop.f32.mrf.mxu1 }
 0x6d7   : > { %3382 = vtanh.f32 %v1705_v9  ;;  %v1697_v38 = vadd.f32 %v2940_v3, %v1696_v2  ;;  %v2950_v23 = vmul.f32 -1.442695, %v1705_v9 }
 0x6d9   : > { %3384 = vtanh.f32 %v1697_v38  ;;  %v2948_v32 = vmul.f32 -1.442695, %v1697_v38 }
 0x6da   : > { %3386 = vpow2.f32 %v2949_v22 }
 0x6db   : > { %3388 = vpow2.f32 %v2947_v63 }
 0x6dc   : > { %3390 = vpow2.f32 %v2950_v23 }
 0x6dd   : > { %3392 = vpow2.f32 %v2948_v32 }
 0x6e0   : > { %v3379_v35 = vpop.eup %3378 }
 0x6e1   : > { %1748 = vrot.lane.b32.xlu1 %v3379_v35, %s3504_s17 }
 0x6e2   : > { %v3381_v61 = vpop.eup %3380 }
 0x6e4   : > { %v3383_v42 = vpop.eup %3382 }
 0x6e5   : > { %1744 = vrot.lane.b32.xlu1 %v3381_v61, %s3504_s17  ;;  %1750 = vrot.lane.b32.xlu0 %v3383_v42, %s3504_s17 }
 0x6e6   : > { %v3385_v21 = vpop.eup %3384 }
 0x6e7   : > { %v3387_v33 = vpop.eup %3386 }
 0x6e8   : > { %v1722_v24 = vadd.f32 1.0, %v3387_v33  ;;  %v3389_v36 = vpop.eup %3388 }
 0x6e9   : > { %1746 = vrot.lane.b32.xlu0 %v3385_v21, %s3504_s17  ;;  %v3391_v39 = vpop.eup %3390  ;;  %v1720_v40 = vadd.f32 1.0, %v3389_v36 }
 0x6ea   : > { %3394 = vrcp.f32 %v1722_v24  ;;  %v1723_v41 = vadd.f32 1.0, %v3391_v39  ;;  %v3393_v44 = vpop.eup %3392 }
 0x6eb   : > { %3396 = vrcp.f32 %v1720_v40  ;;  %v1721_v45 = vadd.f32 1.0, %v3393_v44 }
 0x6ec   : > { %3398 = vrcp.f32 %v1723_v41 }
 0x6ed   : > { %3400 = vrcp.f32 %v1721_v45 }
 0x6f7   : > { %v3395_v48 = vpop.eup %3394 }
 0x6f8   : > { %v3397_v52 = vpop.eup %3396  ;;  %v1738_v3 = vmul.f32 %v3395_v48, %v3821_v10 }
 0x6f9   : > { %v3399_v54 = vpop.eup %3398  ;;  %v1736_v29 = vmul.f32 %v3397_v52, %v3823_v11 }
 0x6fa   : > { %v3401_v1 = vpop.eup %3400  ;;  %v1739_v15 = vmul.f32 %v3399_v54, %v3833_v16 }
 0x6fb   : > { %v1737_v10 = vmul.f32 %v3401_v1, %v3841_v0 }
 0x753   : > { %v1749_v49 = vpop.permute.xlu1 %1748 }
 0x754   : > { %v1758_v50 = vmul.f32 %v3395_v48, %v1749_v49 }
 0x756   : > { %1768 = vrot.lane.b32.xlu1 %v1758_v50, %s3502_s28 }
 0x757   : > { %v1745_v53 = vpop.permute.xlu1 %1744  ;;  %v1751_v14 = vpop.permute.xlu0 %1750 }
 0x758   : > { %v1756_v37 = vmul.f32 %v3397_v52, %v1745_v53  ;;  %v1759_v59 = vmul.f32 %v3399_v54, %v1751_v14  ;;  %v3323_v14 = vld [vmem:[%s4357_s6 + $0x60] ss:$8 sps:$4 sm:$0xff]  }
 0x75a   : > { %1764 = vrot.lane.b32.xlu1 %v1756_v37, %s3502_s28  ;;  %1770 = vrot.lane.b32.xlu0 %v1759_v59, %s3502_s28 }
 0x75b   : > { %v1747_v58 = vpop.permute.xlu0 %1746 }
 0x75c   : > { %v1757_v31 = vmul.f32 %v3401_v1, %v1747_v58  ;;  %v3326_v58 = vld [vmem:[%s4357_s6 + $0x50] ss:$8 sps:$4 sm:$0xff]  }
 0x75e   : > { %1766 = vrot.lane.b32.xlu0 %v1757_v31, %s3502_s28  ;;  %v3333_v31 = vld [vmem:[%s4359_s8 + $0x80] sm:$0xff]  }
 0x7c8   : > { %v1769_v62 = vpop.permute.xlu1 %1768 }
 0x7c9   : > { %v4084_v6 = vadd.f32 %v1769_v62, %v1738_v3  ;;  %v3334_v3 = vld [vmem:[%s4359_s8 + $0x78] sm:$0xff]   ;;  %v3335_v62 = vld [vmem:[%s4359_s8 + $0x70] sm:$0xff]  }
 0x7cb   : > { %3402 = vtanh.f32 %v4084_v6 }
 0x7cc   : > { %v1765_v7 = vpop.permute.xlu1 %1764  ;;  %v1771_v9 = vpop.permute.xlu0 %1770 }
 0x7cd   : > { %v4089_v2 = vadd.f32 %v1765_v7, %v1736_v29  ;;  %v4091_v38 = vadd.f32 %v1771_v9, %v1739_v15  ;;  %v3336_v29 = vld [vmem:[%s4359_s8 + $0x68] sm:$0xff]   ;;  %v3337_v15 = vld [vmem:[%s4359_s8 + $0x60] sm:$0xff]   ;;  %v3338_v7 = vld [vmem:[%s4359_s8 + $0x58] sm:$0xff]  }
 0x7cf   : > { %3404 = vtanh.f32 %v4089_v2 }
 0x7d0   : > { %3406 = vtanh.f32 %v4091_v38  ;;  %v1767_v35 = vpop.permute.xlu0 %1766 }
 0x7d1   : > { %v4096_v61 = vadd.f32 %v1767_v35, %v1737_v10 }
 0x7d3   : > { %3408 = vtanh.f32 %v4096_v61 }
 0x7d8   : > { %v3403_v11 = vpop.eup %3402 }
 0x7d9   : > { %1792 = vrot.lane.b32.xlu1 %v3403_v11, %s3504_s17 }
 0x7dc   : > { %v3405_v16 = vpop.eup %3404 }
 0x7dd   : > { %v3407_v42 = vpop.eup %3406  ;;  %1788 = vrot.lane.b32.xlu1 %v3405_v16, %s3504_s17 }
 0x7de   : > { %1794 = vrot.lane.b32.xlu0 %v3407_v42, %s3504_s17 }
 0x7e0   : > { %v3409_v21 = vpop.eup %3408 }
 0x7e2   : > { %1790 = vrot.lane.b32.xlu0 %v3409_v21, %s3504_s17 }
 0x84b   : > { %v1793_v22 = vpop.permute.xlu1 %1792 }
 0x84c   : > { %v1802_v63 = vmul.f32 %v3395_v48, %v1793_v22  ;;  %v3320_v48 = vld [vmem:[%s4357_s6 + $0x70] ss:$8 sps:$4 sm:$0xff]  }
 0x84e   : > { %v1806_v33 = vmax.f32 %v1802_v63, 0.0 }
 0x84f   : > { %v1789_v23 = vpop.permute.xlu1 %1788 }
 0x850   : > { %v1795_v0 = vpop.permute.xlu0 %1794  ;;  %v1800_v36 = vmul.f32 %v3397_v52, %v1789_v23  ;;  %v3322_v52 = vld [vmem:[%s4357_s6 + $0x74] ss:$8 sps:$4 sm:$0xff]  }
 0x851   : > { %v1803_v32 = vmul.f32 %v3399_v54, %v1795_v0  ;;  %v3325_v54 = vld [vmem:[%s4357_s6 + $0x64] ss:$8 sps:$4 sm:$0xff]   ;;  %1977 = vmatprep.subr.bf16.mxu0 %v3322_v52 }
 0x852   : > { %v1804_v45 = vmax.f32 %v1800_v36, 0.0  ;;  %1978 = vmatpush1.bf16.msra.mxu0 %v3320_v48 }
 0x853   : > { %v1807_v24 = vmax.f32 %v1803_v32, 0.0  ;;  %1979 = vmatprep.subr.bf16.mxu0 %v3325_v54 }
 0x854   : > { %v1791_v39 = vpop.permute.xlu0 %1790 }
 0x855   : > { %v4103_v40 = vpack.i.bf16 %v1807_v24, %v1806_v33  ;;  %v1809_v41 = vpack.c.bf16 %v1807_v24, %v1806_v33  ;;  %v1801_v44 = vmul.f32 %v3401_v1, %v1791_v39  ;;  %v3328_v1 = vld [vmem:[%s4357_s6 + $0x54] ss:$8 sps:$4 sm:$0xff]  }
 0x856   : > { %1980 = vmatpush1.bf16.msra.mxu0 %v3323_v14 }
 0x857   : > { %v1805_v49 = vmax.f32 %v1801_v44, 0.0  ;;  %1814 = vrot.lane.b32.xlu1 %v1809_v41, %s3502_s28  ;;  %1981 = vmatprep.subr.bf16.mxu0 %v3328_v1 }
 0x859   : > { %v4106_v50 = vpack.i.bf16 %v1805_v49, %v1804_v45  ;;  %v1808_v53 = vpack.c.bf16 %v1805_v49, %v1804_v45 }
 0x85a   : > { %1982 = vmatpush1.bf16.msra.mxu0 %v3326_v58 }
 0x85b   : > { %1812 = vrot.lane.b32.xlu0 %v1808_v53, %s3502_s28 }
 0x8c9   : > { %v1815_v37 = vpop.permute.xlu1 %1814 }
 0x8ca   : > { %3147 = vmatprep.subr.bf16.mxu1 %v1815_v37 }
 0x8cb   : > { %3148 = vmatpush3.bf16.msra.mxu1 %v1815_v37 }
 0x8cd   : > { %v1813_v59 = vpop.permute.xlu0 %1812 }
 0x8ce   : > { %3149 = vmatprep.subr.bf16.mxu1 %v1813_v59 }
 0x8cf   : > { %3150 = vmatpush3.bf16.msra.mxu1 %v1813_v59 }
 0x8d0   : > { %2167 = vmatprep.subr.bf16.mxu1 %v3495_v17 }
 0x8d2   : > { %3152 = vmatmul.mubr.msk.bf16.vlgmr.msra.gmra.mxu1 %vm636_vm3, %v3853_v25  ;;  %v3331_v25 = vld [vmem:[%s4357_s6 + $0x44] ss:$8 sps:$4 sm:$0xff]  }
 0x8d3   : > { %3155 = vmatprep.mubr.msk.bf16.mxu1 %vm636_vm3, %v3752_v12  ;;  %v3329_v12 = vld [vmem:[%s4357_s6 + $0x40] ss:$8 sps:$4 sm:$0xff]   ;;  %1983 = vmatprep.subr.bf16.mxu0 %v3331_v25 }
 0x8d4   : > { %1984 = vmatpush1.bf16.msra.mxu0 %v3329_v12 }
 0x8da   : > { %3156 = vmatmul.mubr.msk.bf16.gmra.mxu1 %vm636_vm3, %v3864_v18  ;;  %v3332_v18 = vld [vmem:[%s4359_s8 + $0x88] sm:$0xff]  }
 0x8db   : > { %2168 = vmatpush1.bf16.msra.mxu1 %v3332_v18 }
 0x8dc   : > { %2169 = vmatprep.subr.bf16.mxu1 %v3495_v17 }
 0x8df   : > { %2170 = vmatpush1.bf16.msra.mxu1 %v3333_v31 }
 0x8e0   : > { %2171 = vmatprep.subr.bf16.mxu1 %v3495_v17 }
 0x8e3   : > { %2172 = vmatpush1.bf16.msra.mxu1 %v3334_v3 }
 0x8e4   : > { %2173 = vmatprep.subr.bf16.mxu1 %v3495_v17 }
 0x8e7   : > { %2174 = vmatpush1.bf16.msra.mxu1 %v3335_v62 }
 0x8e8   : > { %2175 = vmatprep.subr.bf16.mxu1 %v3495_v17 }
 0x8eb   : > { %2176 = vmatpush1.bf16.msra.mxu1 %v3336_v29 }
 0x8ec   : > { %2177 = vmatprep.subr.bf16.mxu1 %v3495_v17 }
 0x8ef   : > { %2178 = vmatpush1.bf16.msra.mxu1 %v3337_v15 }
 0x8f0   : > { %2179 = vmatprep.subr.bf16.mxu1 %v3495_v17 }
 0x8f3   : > { %2180 = vmatpush1.bf16.msra.mxu1 %v3338_v7 }
 0x8f4   : > { %2181 = vmatprep.subr.bf16.mxu1 %v3495_v17 }
 0x8f7   : > { %2182 = vmatpush1.bf16.msra.mxu1 %v3339_v60 }
 0x8f8   : > { %2195 = vmatprep.subr.bf16.mxu1 %v3495_v17 }
 0x992   : > { %v3153_v9 = vpop.f32.mrf.mxu1 }
 0x994   : > { %v1852_v10 = vpop.f32.mrf.mxu1 }
 0x995   : > { %v1883_v16 = vsel %vm636_vm3, %v1852_v10, %v3252_v47  ;;  %v1885_v47 = vsel %vm636_vm3, %v3153_v9, %v3257_v56 }
 0x996   : > { %v3154_v35 = vpop.f32.mrf.mxu1 }
 0x997   : > { %v1886_v0 = vsel %vm636_vm3, %v3154_v35, %v3258_v55 }
 0x998   : > { %v1855_v11 = vpop.f32.mrf.mxu1  ;;  %v1901_v32 = vpack.c.bf16 %v1886_v0, %v1885_v47 }
 0x999   : > { %v1884_v42 = vsel %vm636_vm3, %v1855_v11, %v3253_v46 }
 0x99a   : > { %v1900_v21 = vpack.c.bf16 %v1884_v42, %v1883_v16  ;;  %v3157_v22 = vpop.f32.mrf.mxu1 }
 0x99b   : > { %v1889_v56 = vsel %vm636_vm3, %v3157_v22, %v3267_v20  ;;  %v1914_v20 = vrot.slane %v2963_v8, %v1111_v28 }
 0x99c   : > { %v1868_v63 = vpop.f32.mrf.mxu1  ;;  %2972 = vmatmul.mubr.msk.bf16.vlgmr.msra.gmra.mxu0 %vm1155_vm2, %v1900_v21 }
 0x99d   : > { %2011 = vmatprep.mubr.bf16.mxu0 %v3495_v17  ;;  %v1887_v33 = vsel %vm636_vm3, %v1868_v63, %v3262_v5  ;;  %v3341_v5 = vld [vmem:[%s4359_s8 + $0x90] sm:$0xff]  }
 0x99e   : > { %v3158_v23 = vpop.f32.mrf.mxu1 }
 0x99f   : > { %v1890_v51 = vsel %vm636_vm3, %v3158_v23, %v3268_v19 }
 0x9a0   : > { %v1871_v43 = vpop.f32.mrf.mxu1  ;;  %v1903_v24 = vpack.c.bf16 %v1890_v51, %v1889_v56 }
 0x9a1   : > { %v1888_v46 = vsel %vm636_vm3, %v1871_v43, %v3263_v4  ;;  %v3340_v4 = vld [vmem:[%s4359_s8 + $0x98] sm:$0xff]  }
 0x9a2   : > { %v1902_v55 = vpack.c.bf16 %v1888_v46, %v1887_v33  ;;  %2196 = vmatpush2.bf16.msra.mxu1 %v3340_v4 }
 0x9a3   : > { %2197 = vmatprep.subr.bf16.mxu1 %v3495_v17 }
 0x9a4   : > { %2973 = vmatmul.mubr.msk.bf16.gmra.mxu0 %vm1155_vm2, %v1901_v32 }
 0x9a5   : > { %2021 = vmatprep.mubr.bf16.mxu0 %v3495_v17 }
 0x9a6   : > { %2198 = vmatpush2.bf16.msra.mxu1 %v3341_v5 }
 0x9ac   : > { %2974 = vmatmul.mubr.msk.bf16.gmra.mxu0 %vm1155_vm2, %v1902_v55 }
 0x9ad   : > { %2031 = vmatprep.mubr.bf16.mxu0 %v3495_v17 }
 0x9b4   : > { %2975 = vmatmul.mubr.msk.bf16.gmra.mxu0 %vm1155_vm2, %v1903_v24 }
 0x9b5   : > { %3167 = vmatprep.mubr.msk.bf16.mxu0 %vm1155_vm2, %v4027_v57  ;;  %v1910_v57 = vrot.slane %v2963_v8, %v1107_v13 }
 0xa5c   : > { %v2003_v19 = vpop.f32.mrf.mxu0 }
 0xa5d   : > { %v2004_v44 = vadd.f32 %v2003_v19, %v1910_v57 }
 0xa5e   : > { %v2005_v36 = vpop.f32.mrf.mxu0 }
 0xa5f   : > { %v2006_v41 = vadd.f32 %v2005_v36, %v1914_v20  ;;  %v2042_v14 = vmax.f32 %v2004_v44, 0.0 }
 0xa60   : > { %v2007_v39 = vpop.f32.mrf.mxu0 }
 0xa61   : > { %v2008_v17 = vadd.f32 %v2007_v39, %v1910_v57  ;;  %v2043_v52 = vmax.f32 %v2006_v41, 0.0 }
 0xa62   : > { %v2009_v45 = vpop.f32.mrf.mxu0 }
 0xa63   : > { %v2010_v49 = vadd.f32 %v2009_v45, %v1914_v20  ;;  %v2044_v53 = vmax.f32 %v2008_v17, 0.0 }
 0xa64   : > { %v2013_v48 = vpop.f32.mrf.mxu0 }
 0xa65   : > { %v2045_v54 = vmax.f32 %v2010_v49, 0.0  ;;  %v2079_v1 = vpack.c.bf16 %v2044_v53, %v2042_v14  ;;  %v2014_v27 = vadd.f32 %v2013_v48, %v1910_v57 }
 0xa66   : > { %v2015_v37 = vpop.f32.mrf.mxu0 }
 0xa67   : > { %v2080_v59 = vpack.c.bf16 %v2045_v54, %v2043_v52  ;;  %v2016_v28 = vadd.f32 %v2015_v37, %v1914_v20  ;;  %v2046_v29 = vmax.f32 %v2014_v27, 0.0 }
 0xa68   : > { %v2017_v58 = vpop.f32.mrf.mxu0 }
 0xa69   : > { %v2018_v25 = vadd.f32 %v2017_v58, %v1910_v57  ;;  %3008 = vmatprep.mubr.msk.bf16.mxu1 %vm636_vm3, %v2080_v59  ;;  %v2047_v3 = vmax.f32 %v2016_v28, 0.0 }
 0xa6a   : > { %v2019_v13 = vpop.f32.mrf.mxu0  ;;  %2200 = vmatmul.mubr.bf16.vlgmr.msra.gmra.mxu1 %v2079_v1 }
 0xa6b   : > { %v2020_v12 = vadd.f32 %v2019_v13, %v1914_v20  ;;  %v2048_v18 = vmax.f32 %v2018_v25, 0.0 }
 0xa6c   : > { %v2023_v31 = vpop.f32.mrf.mxu0 }
 0xa6d   : > { %v2049_v62 = vmax.f32 %v2020_v12, 0.0  ;;  %v2081_v9 = vpack.c.bf16 %v2048_v18, %v2046_v29  ;;  %v2024_v16 = vadd.f32 %v2023_v31, %v1910_v57 }
 0xa6e   : > { %v2025_v15 = vpop.f32.mrf.mxu0 }
 0xa6f   : > { %v2082_v7 = vpack.c.bf16 %v2049_v62, %v2047_v3  ;;  %v2026_v35 = vadd.f32 %v2025_v15, %v1914_v20  ;;  %v2050_v47 = vmax.f32 %v2024_v16, 0.0 }
 0xa70   : > { %v2027_v10 = vpop.f32.mrf.mxu0 }
 0xa71   : > { %v2028_v11 = vadd.f32 %v2027_v10, %v1910_v57  ;;  %3009 = vmatprep.mubr.msk.bf16.mxu1 %vm636_vm3, %v2082_v7  ;;  %v2051_v0 = vmax.f32 %v2026_v35, 0.0 }
 0xa72   : > { %v2029_v42 = vpop.f32.mrf.mxu0  ;;  %2208 = vmatmul.mubr.bf16.gmra.mxu1 %v2081_v9 }
 0xa73   : > { %v2030_v21 = vadd.f32 %v2029_v42, %v1914_v20  ;;  %v2052_v22 = vmax.f32 %v2028_v11, 0.0 }
 0xa74   : > { %v2033_v63 = vpop.f32.mrf.mxu0 }
 0xa75   : > { %v2053_v23 = vmax.f32 %v2030_v21, 0.0  ;;  %v2083_v46 = vpack.c.bf16 %v2052_v22, %v2050_v47  ;;  %v2034_v56 = vadd.f32 %v2033_v63, %v1910_v57 }
 0xa76   : > { %v2035_v32 = vpop.f32.mrf.mxu0 }
 0xa77   : > { %v2084_v43 = vpack.c.bf16 %v2053_v23, %v2051_v0  ;;  %v2036_v55 = vadd.f32 %v2035_v32, %v1914_v20  ;;  %v2054_v19 = vmax.f32 %v2034_v56, 0.0 }
 0xa78   : > { %v2037_v33 = vpop.f32.mrf.mxu0 }
 0xa79   : > { %v2038_v51 = vadd.f32 %v2037_v33, %v1910_v57  ;;  %3010 = vmatprep.mubr.msk.bf16.mxu1 %vm636_vm3, %v2084_v43  ;;  %v2055_v5 = vmax.f32 %v2036_v55, 0.0 }
 0xa7a   : > { %v2039_v24 = vpop.f32.mrf.mxu0  ;;  %2216 = vmatmul.mubr.bf16.gmra.mxu1 %v2083_v46 }
 0xa7b   : > { %v2040_v60 = vadd.f32 %v2039_v24, %v1914_v20  ;;  %v2056_v4 = vmax.f32 %v2038_v51, 0.0  ;;  %v2997_v20 = vld [vmem:[%s4360_s9 + $0x1] ss:$0 sm:$0xff] }
 0xa7d   : > { %v2057_v8 = vmax.f32 %v2040_v60, 0.0  ;;  %v2085_v39 = vpack.c.bf16 %v2056_v4, %v2054_v19 }
 0xa7f   : > { %v2086_v36 = vpack.c.bf16 %v2057_v8, %v2055_v5 }
 0xa81   : > { %3011 = vmatprep.mubr.msk.bf16.mxu1 %vm636_vm3, %v2086_v36 }
 0xa82   : > { %2224 = vmatmul.mubr.bf16.gmra.mxu1 %v2085_v39 }
 0xb2a   : > { %v2201_v41 = vpop.f32.mrf.mxu1 }
 0xb2b   : > { %v4237_v3 = vadd.f32 %v2997_v20, %v2201_v41 }
 0xb2c   : > { %v2203_v17 = vpop.f32.mrf.mxu1 }
 0xb2d   : > { %v3012_v10 = vmul.f32 -1.442695, %v4237_v3 }
 0xb2e   : > { %v2204_v44 = vpop.f32.mrf.mxu1 }
 0xb2f   : > { %v4243_v35 = vadd.f32 %v2997_v20, %v2204_v44 }
 0xb30   : > { %v2206_v45 = vpop.f32.mrf.mxu1 }
 0xb31   : > { %v3013_v16 = vmul.f32 -1.442695, %v4243_v35 }
 0xb32   : > { %v2209_v49 = vpop.f32.mrf.mxu1 }
 0xb33   : > { %v4228_v1 = vadd.f32 %v2997_v20, %v2209_v49 }
 0xb34   : > { %v2211_v53 = vpop.f32.mrf.mxu1 }
 0xb35   : > { %v3014_v18 = vmul.f32 -1.442695, %v4228_v1 }
 0xb36   : > { %v2212_v48 = vpop.f32.mrf.mxu1 }
 0xb37   : > { %v4240_v15 = vadd.f32 %v2997_v20, %v2212_v48 }
 0xb38   : > { %v2214_v57 = vpop.f32.mrf.mxu1 }
 0xb39   : > { %v3015_v11 = vmul.f32 -1.442695, %v4240_v15 }
 0xb3a   : > { %v2217_v52 = vpop.f32.mrf.mxu1 }
 0xb3b   : > { %v4226_v37 = vadd.f32 %v2997_v20, %v2217_v52 }
 0xb3c   : > { %v2219_v54 = vpop.f32.mrf.mxu1 }
 0xb3d   : > { %v3016_v28 = vmul.f32 -1.442695, %v4226_v37 }
 0xb3e   : > { %v2220_v14 = vpop.f32.mrf.mxu1 }
 0xb3f   : > { %v4231_v25 = vadd.f32 %v2997_v20, %v2220_v14  ;;  %3410 = vpow2.f32 %v3016_v28 }
 0xb40   : > { %v2222_v59 = vpop.f32.mrf.mxu1 }
 0xb41   : > { %v3017_v62 = vmul.f32 -1.442695, %v4231_v25 }
 0xb42   : > { %v2225_v58 = vpop.f32.mrf.mxu1 }
 0xb43   : > { %v4233_v27 = vadd.f32 %v2997_v20, %v2225_v58 }
 0xb44   : > { %v2227_v13 = vpop.f32.mrf.mxu1 }
 0xb45   : > { %v3018_v12 = vmul.f32 -1.442695, %v4233_v27 }
 0xb46   : > { %v2228_v31 = vpop.f32.mrf.mxu1 }
 0xb47   : > { %v2229_v29 = vadd.f32 %v2997_v20, %v2228_v31  ;;  %3412 = vpow2.f32 %v3018_v12 }
 0xb48   : > { %v2230_v7 = vpop.f32.mrf.mxu1  ;;  %3414 = vpow2.f32 %v3014_v18 }
 0xb49   : > { %v3019_v9 = vmul.f32 -1.442695, %v2229_v29  ;;  %3416 = vpow2.f32 %v3017_v62  ;;  %v3345_v7 = vld [vmem:[%s4361_s10 + $0x20] sm:$0xff]  }
 0xb4b   : > { %3418 = vpow2.f32 %v3019_v9 }
 0xb4c   : > { %3420 = vpow2.f32 %v3012_v10  ;;  %v3411_v42 = vpop.eup %3410 }
 0xb4d   : > { %3422 = vpow2.f32 %v3015_v11  ;;  %v2260_v0 = vadd.f32 1.0, %v3411_v42 }
 0xb4e   : > { %3424 = vpow2.f32 %v3013_v16 }
 0xb54   : > { %v3413_v21 = vpop.eup %3412 }
 0xb55   : > { %v2262_v22 = vadd.f32 1.0, %v3413_v21  ;;  %v3415_v63 = vpop.eup %3414 }
 0xb56   : > { %v3417_v23 = vpop.eup %3416  ;;  %v2258_v43 = vadd.f32 1.0, %v3415_v63 }
 0xb57   : > { %3426 = vrcp.f32 %v2262_v22  ;;  %v2261_v33 = vadd.f32 1.0, %v3417_v23 }
 0xb58   : > { %v3419_v47 = vpop.eup %3418  ;;  %3428 = vrcp.f32 %v2260_v0 }
 0xb59   : > { %v2263_v32 = vadd.f32 1.0, %v3419_v47  ;;  %v3421_v46 = vpop.eup %3420 }
 0xb5a   : > { %v3423_v55 = vpop.eup %3422  ;;  %v2256_v51 = vadd.f32 1.0, %v3421_v46 }
 0xb5b   : > { %3430 = vrcp.f32 %v2263_v32  ;;  %v2259_v56 = vadd.f32 1.0, %v3423_v55  ;;  %v3425_v24 = vpop.eup %3424 }
 0xb5c   : > { %3432 = vrcp.f32 %v2258_v43  ;;  %v2257_v60 = vadd.f32 1.0, %v3425_v24 }
 0xb5d   : > { %3434 = vrcp.f32 %v2261_v33  ;;  %v3031_v33 = vld [vmem:[%s4362_s11 + $0x1] ss:$0 sm:$0xff] }
 0xb5e   : > { %3436 = vrcp.f32 %v2256_v51 }
 0xb5f   : > { %3438 = vrcp.f32 %v2259_v56 }
 0xb60   : > { %3440 = vrcp.f32 %v2257_v60 }
 0xb64   : > { %v3427_v4 = vpop.eup %3426 }
 0xb65   : > { %2300 = vrot.lane.b32.xlu1 %v3427_v4, %s3502_s28  ;;  %v3429_v5 = vpop.eup %3428 }
 0xb68   : > { %v3431_v8 = vpop.eup %3430 }
 0xb69   : > { %2302 = vrot.lane.b32.xlu0 %v3431_v8, %s3502_s28  ;;  %2296 = vrot.lane.b32.xlu1 %v3429_v5, %s3502_s28  ;;  %v3433_v19 = vpop.eup %3432 }
 0xb6a   : > { %v3435_v36 = vpop.eup %3434 }
 0xb6b   : > { %v3437_v39 = vpop.eup %3436 }
 0xb6c   : > { %v3439_v41 = vpop.eup %3438 }
 0xb6d   : > { %2298 = vrot.lane.b32.xlu0 %v3435_v36, %s3502_s28  ;;  %2292 = vrot.lane.b32.xlu1 %v3433_v19, %s3502_s28  ;;  %v3441_v17 = vpop.eup %3440 }
 0xb71   : > { %2294 = vrot.lane.b32.xlu0 %v3439_v41, %s3502_s28  ;;  %2288 = vrot.lane.b32.xlu1 %v3437_v39, %s3502_s28 }
 0xb75   : > { %2290 = vrot.lane.b32.xlu0 %v3441_v17, %s3502_s28 }
 0xbd7   : > { %v2301_v44 = vpop.permute.xlu1 %2300 }
 0xbd8   : > { %v2318_v53 = vmul.f32 %v2301_v44, %v4233_v27 }
 0xbdb   : > { %v2303_v45 = vpop.permute.xlu0 %2302  ;;  %v2297_v49 = vpop.permute.xlu1 %2296 }
 0xbdc   : > { %v2319_v48 = vmul.f32 %v2303_v45, %v2229_v29  ;;  %v2316_v20 = vmul.f32 %v2297_v49, %v4226_v37  ;;  %v3342_v29 = vld [vmem:[%s4361_s10 + $0x38] sm:$0xff]  }
 0xbde   : > { %v2323_v57 = vpack.c.bf16 %v2319_v48, %v2318_v53 }
 0xbdf   : > { %v2299_v52 = vpop.permute.xlu0 %2298  ;;  %v2293_v54 = vpop.permute.xlu1 %2292 }
 0xbe0   : > { %v2317_v14 = vmul.f32 %v2299_v52, %v4231_v25  ;;  %2334 = vrot.lane.b32.xlu1 %v2323_v57, %s3503_s13  ;;  %v2314_v28 = vmul.f32 %v2293_v54, %v4228_v1 }
 0xbe2   : > { %v2322_v59 = vpack.c.bf16 %v2317_v14, %v2316_v20 }
 0xbe3   : > { %v2295_v58 = vpop.permute.xlu0 %2294  ;;  %v2289_v12 = vpop.permute.xlu1 %2288 }
 0xbe4   : > { %v2315_v13 = vmul.f32 %v2295_v58, %v4240_v15  ;;  %2332 = vrot.lane.b32.xlu0 %v2322_v59, %s3503_s13  ;;  %v2312_v31 = vmul.f32 %v2289_v12, %v4237_v3 }
 0xbe6   : > { %v2321_v27 = vpack.c.bf16 %v2315_v13, %v2314_v28 }
 0xbe7   : > { %v2291_v18 = vpop.permute.xlu0 %2290 }
 0xbe8   : > { %v2313_v62 = vmul.f32 %v2291_v18, %v4243_v35  ;;  %2330 = vrot.lane.b32.xlu1 %v2321_v27, %s3503_s13 }
 0xbea   : > { %v2320_v37 = vpack.c.bf16 %v2313_v62, %v2312_v31 }
 0xbec   : > { %3280 = vrot.lane.b32.xlu1 %v4106_v50, %s3504_s17  ;;  %2328 = vrot.lane.b32.xlu0 %v2320_v37, %s3503_s13  ;;  %v3344_v50 = vld [vmem:[%s4361_s10 + $0x28] sm:$0xff]  }
 0xbf0   : > { %3285 = vrot.lane.b32.xlu0 %v4103_v40, %s3504_s17  ;;  %v3343_v40 = vld [vmem:[%s4361_s10 + $0x30] sm:$0xff]  }
 0xc52   : > { %v2335_v1 = vpop.permute.xlu1 %2334 }
 0xc53   : > { %3159 = vmatprep.subr.bf16.mxu0 %v2335_v1 }
 0xc54   : > { %3160 = vmatpush3.bf16.msra.mxu0 %v2335_v1 }
 0xc56   : > { %v2333_v25 = vpop.permute.xlu0 %2332 }
 0xc57   : > { %3161 = vmatprep.subr.bf16.mxu0 %v2333_v25 }
 0xc58   : > { %3162 = vmatpush3.bf16.msra.mxu0 %v2333_v25 }
 0xc5a   : > { %v2331_v3 = vpop.permute.xlu1 %2330 }
 0xc5b   : > { %3163 = vmatprep.subr.bf16.mxu0 %v2331_v3 }
 0xc5c   : > { %3164 = vmatpush3.bf16.msra.mxu0 %v2331_v3 }
 0xc5e   : > { %v2329_v15 = vpop.permute.xlu0 %2328  ;;  %v3281_v35 = vpop.permute.xlu1 %3280 }
 0xc5f   : > { %3165 = vmatprep.subr.bf16.mxu0 %v2329_v15  ;;  %v3283_v42 = vunpack.i.h.bf16 %v3281_v35  ;;  %v3282_v21 = vunpack.i.l.bf16 %v3281_v35 }
 0xc60   : > { %3166 = vmatpush3.bf16.msra.mxu0 %v2329_v15 }
 0xc61   : > { %3171 = vmatprep.subr.bf16.mxu0 %v3342_v29 }
 0xc62   : > { %v3286_v10 = vpop.permute.xlu0 %3285 }
 0xc63   : > { %3168 = vmatmul.mubr.msk.bf16.vlgmr.msra.gmra.mxu0 %vm1155_vm2, %v4051_v34  ;;  %v3288_v34 = vunpack.i.h.bf16 %v3286_v10  ;;  %v3287_v22 = vunpack.i.l.bf16 %v3286_v10 }
 0xc64   : > { %3172 = vmatpush3.bf16.msra.mxu0 %v3342_v29  ;;  %v3505_v29 = vmov 7  }
 0xc65   : > { %3173 = vmatprep.subr.bf16.mxu0 %v3343_v40  ;;  %3289 = vset.pattern.permute.xlu1 %v3505_v29 }
 0xc66   : > { %3290 = vset.pattern.permute.xlu0 %v3505_v29 }
 0xc68   : > { %3174 = vmatpush3.bf16.msra.mxu0 %v3343_v40 }
 0xc69   : > { %3175 = vmatprep.subr.bf16.mxu0 %v3344_v50 }
 0xc6c   : > { %3176 = vmatpush3.bf16.msra.mxu0 %v3344_v50 }
 0xc6d   : > { %3177 = vmatprep.subr.bf16.mxu0 %v3345_v7 }
 0xc70   : > { %3178 = vmatpush3.bf16.msra.mxu0 %v3345_v7 }
 0xd23   : > { %v3169_v9 = vpop.f32.mrf.mxu0 }
 0xd24   : > { %v2407_v32 = vsel %vm636_vm3, %v3169_v9, %v3287_v22 }
 0xd25   : > { %v2374_v11 = vpop.f32.mrf.mxu0 }
 0xd26   : > { %v2405_v23 = vsel %vm636_vm3, %v2374_v11, %v3282_v21 }
 0xd27   : > { %v3170_v16 = vpop.f32.mrf.mxu0 }
 0xd28   : > { %v2408_v63 = vsel %vm636_vm3, %v3170_v16, %v3288_v34 }
 0xd29   : > { %v2377_v0 = vpop.f32.mrf.mxu0  ;;  %v2419_v46 = vpack.c.bf16 %v2408_v63, %v2407_v32 }
 0xd2a   : > { %v2406_v47 = vsel %vm636_vm3, %v2377_v0, %v3283_v42  ;;  %v2604_v0 = vld [vmem:[%s3606_s25 + $0x8] sm:$0xff] }
 0xd2b   : > { %v2418_v43 = vpack.c.bf16 %v2406_v47, %v2405_v23  ;;  %v2605_v23 = vld [vmem:[%s3606_s25 + $0x10] sm:$0xff] }
 0xd2d   : > { %3179 = vmatprep.mubr.msk.bf16.mxu0 %vm1155_vm2, %v2418_v43 }
 0xd2e   : > { %3180 = vmatmul.mubr.msk.bf16.vlgmr.msra.gmra.mxu0 %vm1155_vm2, %v2419_v46 }
 0xdee   : > { %v3181_v55 = vpop.f32.mrf.mxu0 }
 0xdef   : > { %v2501_v51 = vadd.f32 %v3181_v55, %v3031_v33 }
 0xdf0   : > { %v2492_v56 = vpop.f32.mrf.mxu0 }
 0xdf1   : > { %3442 = vtanh.f32 %v2501_v51  ;;  %v2493_v24 = vadd.f32 %v3031_v33, %v2492_v56  ;;  %v3040_v17 = vmul.f32 -1.442695, %v2501_v51 }
 0xdf2   : > { %v3182_v60 = vpop.f32.mrf.mxu0 }
 0xdf3   : > { %v2504_v4 = vadd.f32 %v3182_v60, %v3031_v33  ;;  %3444 = vtanh.f32 %v2493_v24  ;;  %v3038_v44 = vmul.f32 -1.442695, %v2493_v24 }
 0xdf4   : > { %v2495_v5 = vpop.f32.mrf.mxu0 }
 0xdf5   : > { %3446 = vtanh.f32 %v2504_v4  ;;  %v2496_v8 = vadd.f32 %v3031_v33, %v2495_v5  ;;  %v3041_v45 = vmul.f32 -1.442695, %v2504_v4 }
 0xdf7   : > { %3448 = vtanh.f32 %v2496_v8  ;;  %v3039_v49 = vmul.f32 -1.442695, %v2496_v8 }
 0xdf8   : > { %3450 = vpow2.f32 %v3040_v17 }
 0xdf9   : > { %3452 = vpow2.f32 %v3038_v44 }
 0xdfa   : > { %3454 = vpow2.f32 %v3041_v45 }
 0xdfb   : > { %3456 = vpow2.f32 %v3039_v49 }
 0xdfe   : > { %v3443_v19 = vpop.eup %3442 }
 0xdff   : > { %2547 = vrot.lane.b32.xlu1 %v3443_v19, %s3504_s17 }
 0xe00   : > { %v3445_v36 = vpop.eup %3444 }
 0xe02   : > { %v3447_v39 = vpop.eup %3446 }
 0xe03   : > { %2543 = vrot.lane.b32.xlu1 %v3445_v36, %s3504_s17  ;;  %2549 = vrot.lane.b32.xlu0 %v3447_v39, %s3504_s17 }
 0xe04   : > { %v3449_v41 = vpop.eup %3448 }
 0xe05   : > { %v3451_v53 = vpop.eup %3450 }
 0xe06   : > { %v2521_v48 = vadd.f32 1.0, %v3451_v53  ;;  %v3453_v57 = vpop.eup %3452 }
 0xe07   : > { %2545 = vrot.lane.b32.xlu0 %v3449_v41, %s3504_s17  ;;  %v3455_v52 = vpop.eup %3454  ;;  %v2519_v54 = vadd.f32 1.0, %v3453_v57 }
 0xe08   : > { %3458 = vrcp.f32 %v2521_v48  ;;  %v2522_v20 = vadd.f32 1.0, %v3455_v52  ;;  %v3457_v14 = vpop.eup %3456 }
 0xe09   : > { %3460 = vrcp.f32 %v2519_v54  ;;  %v2520_v59 = vadd.f32 1.0, %v3457_v14 }
 0xe0a   : > { %3462 = vrcp.f32 %v2522_v20 }
 0xe0b   : > { %3464 = vrcp.f32 %v2520_v59 }
 0xe15   : > { %v3459_v58 = vpop.eup %3458 }
 0xe16   : > { %v3461_v12 = vpop.eup %3460  ;;  %v2537_v15 = vmul.f32 %v3459_v58, %v4084_v6 }
 0xe17   : > { %v3463_v18 = vpop.eup %3462  ;;  %v2535_v7 = vmul.f32 %v3461_v12, %v4089_v2 }
 0xe18   : > { %v3465_v1 = vpop.eup %3464  ;;  %v2538_v9 = vmul.f32 %v3463_v18, %v4091_v38  ;;  %v2603_v38 = vld [vmem:[%s3606_s25] sm:$0xff] }
 0xe19   : > { %v2536_v16 = vmul.f32 %v3465_v1, %v4096_v61  ;;  %v3506_v61 = vmov 8  }
 0xe71   : > { %v2548_v28 = vpop.permute.xlu1 %2547 }
 0xe72   : > { %v2557_v13 = vmul.f32 %v3459_v58, %v2548_v28  ;;  %v3044_v28 = vld [vmem:[%s4363_s12] ss:$0 sm:$0xff] }
 0xe74   : > { %2567 = vrot.lane.b32.xlu1 %v2557_v13, %s3502_s28 }
 0xe75   : > { %v2544_v27 = vpop.permute.xlu1 %2543  ;;  %v2550_v31 = vpop.permute.xlu0 %2549 }
 0xe76   : > { %v2555_v62 = vmul.f32 %v3461_v12, %v2544_v27  ;;  %v2558_v37 = vmul.f32 %v3463_v18, %v2550_v31 }
 0xe78   : > { %2563 = vrot.lane.b32.xlu1 %v2555_v62, %s3502_s28  ;;  %2569 = vrot.lane.b32.xlu0 %v2558_v37, %s3502_s28 }
 0xe79   : > { %v2546_v25 = vpop.permute.xlu0 %2545 }
 0xe7a   : > { %v2556_v3 = vmul.f32 %v3465_v1, %v2546_v25 }
 0xe7c   : > { %2565 = vrot.lane.b32.xlu0 %v2556_v3, %s3502_s28 }
 0xee6   : > { %v2568_v40 = vpop.permute.xlu1 %2567 }
 0xee7   : > { %v2577_v50 = vadd.f32 %v2568_v40, %v2537_v15 }
 0xee9   : > { %3466 = vtanh.f32 %v2577_v50 }
 0xeea   : > { %v2564_v10 = vpop.permute.xlu1 %2563  ;;  %v2570_v35 = vpop.permute.xlu0 %2569 }
 0xeeb   : > { %v2575_v11 = vadd.f32 %v2564_v10, %v2535_v7  ;;  %v2578_v34 = vadd.f32 %v2570_v35, %v2538_v9 }
 0xeed   : > { %3468 = vtanh.f32 %v2575_v11 }
 0xeee   : > { %3470 = vtanh.f32 %v2578_v34  ;;  %v2566_v42 = vpop.permute.xlu0 %2565 }
 0xeef   : > { %v2576_v21 = vadd.f32 %v2566_v42, %v2536_v16 }
 0xef1   : > { %3472 = vtanh.f32 %v2576_v21 }
 0xef6   : > { %v3467_v6 = vpop.eup %3466 }
 0xef7   : > { %2591 = vrot.lane.b32.xlu1 %v3467_v6, %s3504_s17 }
 0xefa   : > { %v3469_v2 = vpop.eup %3468 }
 0xefb   : > { %v3471_v22 = vpop.eup %3470  ;;  %2587 = vrot.lane.b32.xlu1 %v3469_v2, %s3504_s17 }
 0xefc   : > { %2593 = vrot.lane.b32.xlu0 %v3471_v22, %s3504_s17 }
 0xefe   : > { %v3473_v63 = vpop.eup %3472 }
 0xeff   : > { %2607 = vperm.xlu1 %3289, %v2603_v38  }
 0xf00   : > { %2589 = vrot.lane.b32.xlu0 %v3473_v63, %s3504_s17  ;;  %s3191_s17 = smul.u32 24, %s4367_s16 }
 0xf02   : > { %s518_s26 = scalar_lea.vmem %s4354_s3, %s3191_s17  ;;  %s523_s29 = scalar_lea.vmem %s4365_s14, %s3191_s17 }
 0xf03   : > { %3291 = vset.pattern.permute.xlu1 %v3506_v61 }
 0xf04   : > { %2610 = vperm.xlu0 %3290, %v2604_v0   ;;  %2622 = vperm.xlu1 %3291, %v2603_v38  }
 0xf08   : > { %2613 = vperm.xlu0 %3290, %v2605_v23   ;;  %2625 = vperm.xlu1 %3291, %v2604_v0  }
 0xf0c   : > { %2628 = vperm.xlu1 %3291, %v2605_v23   ;;  %3292 = vset.pattern.permute.xlu0 %v3506_v61  ;;  %v2734_v61 = vld [vmem:[%s518_s26] sm:$0xff] }
 0xf0d   : > { %v2773_v23 = vmul.f32 0.0, %v2734_v61 }
 0xf69   : > { %v2592_v47 = vpop.permute.xlu1 %2591 }
 0xf6a   : > { %v2601_v43 = vmul.f32 %v3459_v58, %v2592_v47 }
 0xf6d   : > { %v2588_v33 = vpop.permute.xlu1 %2587 }
 0xf6e   : > { %v2594_v32 = vpop.permute.xlu0 %2593  ;;  %v2599_v56 = vmul.f32 %v3461_v12, %v2588_v33 }
 0xf6f   : > { %v2602_v46 = vmul.f32 %v3463_v18, %v2594_v32  ;;  %v2736_v32 = vld [vmem:[%s518_s26 + $0x10] sm:$0xff] }
 0xf70   : > { %v2775_v33 = vmul.f32 0.0, %v2736_v32 }
 0xf71   : > { %v2642_v55 = vpack.c.bf16 %v2602_v46, %v2601_v43  ;;  %v2767_v46 = vsub.f32 1.0, %v2734_v61 }
 0xf72   : > { %v2590_v51 = vpop.permute.xlu0 %2589 }
 0xf73   : > { %v2600_v24 = vmul.f32 %v3465_v1, %v2590_v51  ;;  %2647 = vrot.lane.b32.xlu0 %v2642_v55, %s3502_s28  ;;  %v3045_v1 = vld [vmem:[#allocation2] ss:$0 sm:$0xff]  ;;  %v2776_v55 = vadd.f32 1.0, %v2773_v23 }
 0xf75   : > { %v2641_v60 = vpack.c.bf16 %v2600_v24, %v2599_v56 }
 0xf77   : > { %2645 = vrot.lane.b32.xlu1 %v2641_v60, %s3502_s28  ;;  %v2735_v60 = vld [vmem:[%s518_s26 + $0x8] sm:$0xff] }
 0xf7a   : > { %v2608_v4 = vpop.permute.xlu1 %2607 }
 0xf7b   : > { %vm2615_vm8 = vcmp.eq.s32.totalorder %v3661_v26, %v2608_v4  ;;  %v2774_v4 = vmul.f32 0.0, %v2735_v60 }
 0xf7c   : > { %v2618_v19 = vsel %vm2615_vm8, 1.0, %v3500_v30 }
 0xf7f   : > { %v2611_v5 = vpop.permute.xlu0 %2610  ;;  %v2623_v8 = vpop.permute.xlu1 %2622 }
 0xf80   : > { %vm2616_vm9 = vcmp.eq.s32.totalorder %v3661_v26, %v2611_v5  ;;  %vm2630_vm10 = vcmp.eq.s32.totalorder %v3661_v26, %v2623_v8 }
 0xf81   : > { %v2633_v36 = vsel %vm2630_vm10, 1.0, %v3500_v30  ;;  %v2619_v39 = vsel %vm2616_vm9, 1.0, %v3500_v30 }
 0xf82   : > { %v2636_v17 = vsub.f32 %v2618_v19, %v2633_v36  ;;  %v2769_v36 = vsub.f32 1.0, %v2736_v32 }
 0xf83   : > { %v2626_v41 = vpop.permute.xlu1 %2625  ;;  %v2614_v53 = vpop.permute.xlu0 %2613 }
 0xf84   : > { %vm2631_vm11 = vcmp.eq.s32.totalorder %v3661_v26, %v2626_v41  ;;  %vm2617_vm12 = vcmp.eq.s32.totalorder %v3661_v26, %v2614_v53  ;;  %v2768_v53 = vsub.f32 1.0, %v2735_v60 }
 0xf85   : > { %v2634_v44 = vsel %vm2631_vm11, 1.0, %v3500_v30  ;;  %v2620_v57 = vsel %vm2617_vm12, 1.0, %v3500_v30 }
 0xf86   : > { %v2637_v45 = vsub.f32 %v2619_v39, %v2634_v44  ;;  %v2778_v39 = vadd.f32 1.0, %v2775_v33 }
 0xf87   : > { %v2629_v48 = vpop.permute.xlu1 %2628 }
 0xf88   : > { %v2639_v49 = vpack.c.bf16 %v2637_v45, %v2636_v17  ;;  %vm2632_vm13 = vcmp.eq.s32.totalorder %v3661_v26, %v2629_v48  ;;  %v2777_v48 = vadd.f32 1.0, %v2774_v4 }
 0xf89   : > { %v2635_v54 = vsel %vm2632_vm13, 1.0, %v3500_v30 }
 0xf8a   : > { %3187 = vmatprep.mubr.msk.bf16.mxu0 %vm636_vm3, %v2639_v49  ;;  %v2638_v20 = vsub.f32 %v2620_v57, %v2635_v54 }
 0xf8c   : > { %v2640_v59 = vpack.c.bf16 %v2638_v20, %v2638_v20 }
 0xfe5   : > { %v2648_v52 = vpop.permute.xlu0 %2647 }
 0xfe6   : > { %3183 = vmatprep.subr.bf16.mxu0 %v2648_v52 }
 0xfe7   : > { %3184 = vmatpush3.bf16.msra.mxu0 %v2648_v52 }
 0xfe9   : > { %v2646_v14 = vpop.permute.xlu1 %2645 }
 0xfea   : > { %3185 = vmatprep.subr.bf16.mxu0 %v2646_v14 }
 0xfeb   : > { %3186 = vmatpush3.bf16.msra.mxu0 %v2646_v14 }
 0xfee   : > { %3188 = vmatmul.mubr.msk.bf16.vlgmr.msra.gmra.mxu0 %vm636_vm3, %v2640_v59 }
0x10ae   : > { %v3189_v58 = vpop.f32.mrf.mxu0 }
0x10af   : > { %v2714_v27 = vmul.f32 %v3189_v58, %v3044_v28 }
0x10b0   : > { %v2691_v26 = vpop.f32.mrf.mxu0 }
0x10b1   : > { %v2712_v13 = vmul.f32 %v3044_v28, %v2691_v26  ;;  %v2721_v62 = vsel %vm636_vm3, %v2714_v27, 0.0 }
0x10b2   : > { %v3190_v12 = vpop.f32.mrf.mxu0 }
0x10b3   : > { %v2715_v30 = vsel %vm636_vm3, %v2712_v13, 0.0 }
0x10b4   : > { %2716 = vadd.xlane.f32.xlu0 %v2715_v30  ;;  %v2694_v18 = vpop.f32.mrf.mxu0 }
0x10b5   : > { %v2713_v31 = vmul.f32 %v3044_v28, %v2694_v18 }
0x10b7   : > { %v2718_v37 = vsel %vm636_vm3, %v2713_v31, 0.0  ;;  %vm2785_vm3 = vcmask 7168  }
0x10b8   : > { %2722 = vadd.xlane.f32.xlu0 %v2721_v62  ;;  %2719 = vadd.xlane.f32.xlu1 %v2718_v37 }
0x113d   : > { %v2717_v25 = vpop.xlane.xlu0 %2716 }
0x113e   : > { %v2731_v3 = vadd.f32 %v3045_v1, %v2717_v25 }
0x1140   : > { %v2743_v29 = vand.u32 2147483647, %v2731_v3  ;;  %v2737_v47 = vsub.f32 0.0, %v2731_v3  ;;  %v2770_v17 = vmul.f32 %v2767_v46, %v2731_v3 }
0x1141   : > { %v2723_v15 = vpop.xlane.xlu0 %2722  ;;  %v2720_v40 = vpop.xlane.xlu1 %2719 }
0x1142   : > { %v2746_v50 = vsub.f32 0.0, %v2743_v29  ;;  %v2733_v7 = vadd.f32 %v3045_v1, %v2723_v15  ;;  %v2732_v9 = vadd.f32 %v3045_v1, %v2720_v40  ;;  %v2740_v51 = vmax.f32 %v2737_v47, 0.0 }
0x1144   : > { %v2749_v10 = vmul.f32 1.442695, %v2746_v50  ;;  %v2745_v35 = vand.u32 2147483647, %v2733_v7  ;;  %v2744_v11 = vand.u32 2147483647, %v2732_v9  ;;  %v2772_v59 = vmul.f32 %v2769_v36, %v2733_v7 }
0x1145   : > { %v2739_v24 = vsub.f32 0.0, %v2733_v7  ;;  %v2738_v5 = vsub.f32 0.0, %v2732_v9  ;;  %v2771_v28 = vmul.f32 %v2768_v53, %v2732_v9 }
0x1146   : > { %3474 = vpow2.f32 %v2749_v10  ;;  %v2748_v34 = vsub.f32 0.0, %v2745_v35  ;;  %v2747_v16 = vsub.f32 0.0, %v2744_v11 }
0x1147   : > { %v2742_v45 = vmax.f32 %v2739_v24, 0.0  ;;  %v2741_v57 = vmax.f32 %v2738_v5, 0.0 }
0x1148   : > { %v2753_v42 = vmul.f32 1.442695, %v2748_v34  ;;  %v2751_v21 = vmul.f32 1.442695, %v2747_v16 }
0x114a   : > { %3476 = vpow2.f32 %v2753_v42 }
0x114b   : > { %3478 = vpow2.f32 %v2751_v21 }
0x1153   : > { %v3475_v6 = vpop.eup %3474 }
0x1154   : > { %v2755_v2 = vadd.f32 1.0, %v3475_v6 }
0x1156   : > { %3480 = vlog2.f32 %v2755_v2 }
0x1157   : > { %v3477_v22 = vpop.eup %3476 }
0x1158   : > { %v3479_v38 = vpop.eup %3478  ;;  %v2757_v63 = vadd.f32 1.0, %v3477_v22 }
0x1159   : > { %v2756_v0 = vadd.f32 1.0, %v3479_v38 }
0x115a   : > { %3482 = vlog2.f32 %v2757_v63 }
0x115b   : > { %3484 = vlog2.f32 %v2756_v0 }
0x1163   : > { %v3481_v43 = vpop.eup %3480 }
0x1164   : > { %v2759_v56 = vmul.f32 0.6931472, %v3481_v43 }
0x1166   : > { %v2764_v8 = vadd.f32 %v2759_v56, %v2740_v51 }
0x1167   : > { %v3483_v19 = vpop.eup %3482 }
0x1168   : > { %v3485_v41 = vpop.eup %3484  ;;  %v2779_v44 = vmul.f32 %v2776_v55, %v2764_v8  ;;  %v2763_v49 = vmul.f32 0.6931472, %v3483_v19 }
0x1169   : > { %v2761_v52 = vmul.f32 0.6931472, %v3485_v41 }
0x116a   : > { %v2782_v54 = vadd.f32 %v2779_v44, %v2770_v17  ;;  %v2766_v20 = vadd.f32 %v2763_v49, %v2742_v45 }
0x116b   : > { %v2765_v14 = vadd.f32 %v2761_v52, %v2741_v57 }
0x116c   : > { %2786 = vst.msk [vmem:[%s523_s29] sm:$0xff] %vm2785_vm3, %v2782_v54  ;;  %v2781_v58 = vmul.f32 %v2778_v39, %v2766_v20 }
0x116d   : > { %v2780_v26 = vmul.f32 %v2777_v48, %v2765_v14 }
0x116e   : > { %v2784_v13 = vadd.f32 %v2781_v58, %v2772_v59 }
0x116f   : > { %v2783_v12 = vadd.f32 %v2780_v26, %v2771_v28 }
0x1170   : > { %2788 = vst.msk [vmem:[%s523_s29 + $0x10] sm:$0xff] %vm2785_vm3, %v2784_v13 }
0x1171   : > { %2787 = vst.msk [vmem:[%s523_s29 + $0x8] sm:$0xff] %vm2785_vm3, %v2783_v12 }
0x1172 PF: > { %s26_s15 = sadd.s32 1, %s3492_s15  }
0x1173   : > { %p23_p4 = scmp.ge.s32.totalorder %s26_s15, 6  }
0x1175   :  { %25 = sbr.rel (!%p23_p4) target bundleno = 3 (0x3), region = 121 }

</bundles_post_ra>
